<compile_context>
chip_gen: v7x
topology: tpu7x:2x2x1
jax: 0.10.0
libtpu: 0.0.40
codegen_flags: <defaults>
</compile_context>

<pallas_src>
import numpy as np
import jax
import jax.numpy as jnp
from jax import lax
from jax.experimental import pallas as pl
from jax.experimental.pallas import tpu as pltpu

# ----------------------- synthetic DGCF hyper-parameters ---------------------
N_USER = 16
N_ITEM = 16
N_NODES = N_USER + N_ITEM          # 32
EMBED = 128                        # args.embed_size (lane-dense slab)
FACTOR = 4                         # args.factor
CHUNK = EMBED // FACTOR            # 32
LAYER = 2                          # args.layer
ITERATION = 2                      # args.iteration
BATCH = 8
FN = FACTOR * N_NODES              # 128 — fused (block-diagonal) matmul width


def _tile_lanes(x, reps):
    return jnp.concatenate([x] * reps, axis=1)


def _tile_sublanes(x, reps):
    return jnp.concatenate([x] * reps, axis=0)


# ------------------------------ Pallas kernel --------------------------------
def _dgcf_kernel(mask_ref, sel_ref, emb0_ref, out_ref, emb_ref, acc_ref, fv_ref):
    """Whole DGCF.computer() with block-diagonal-fused per-factor matmuls."""
    emb_ref[...] = emb0_ref[...]                       # current layer input (N, E)
    acc_ref[...] = emb0_ref[...]                       # running sum for the layer mean
    # factor_values = 1 on every edge, for every factor: single lane-tiled store.
    fv_ref[...] = _tile_lanes(mask_ref[...], FACTOR)   # (N, F*N)

    total_steps = LAYER * ITERATION

    def body(s, carry):
        last_iter = (s % ITERATION) == (ITERATION - 1)
        not_last_step = s < (total_steps - 1)

        mask = mask_ref[...]          # (N, N) 0/1 adjacency
        sel = sel_ref[...]            # (F*N, E) constant block-diagonal selector
        ego = emb_ref[...]            # (N, E) lane-dense layer-input embeddings
        fv = fv_ref[...]              # (N, F*N) per-factor edge logits

        # ---- disentangling(): softmax over the factor axis at every edge ----
        ex = jnp.exp(fv)
        denom = ex[:, 0:N_NODES]
        for f in range(1, FACTOR):
            denom = denom + ex[:, f * N_NODES:(f + 1) * N_NODES]
        inv = pl.reciprocal(denom, approx=True)        # EUP vrcp
        inv = inv * (2.0 - denom * inv)                # one Newton step -> f32 parity
        a_lhs = ex * _tile_lanes(mask * inv, FACTOR)   # (N, F*N) = [A_0|A_1|A_2|A_3]

        # ---- per-factor symmetric degree normalization as one (N, E) scale ---
        # (rsqrt(0)=inf matches the reference; synthetic graph has no isolated nodes)
        d_cols = []
        for f in range(FACTOR):
            deg = jnp.sum(a_lhs[:, f * N_NODES:(f + 1) * N_NODES],
                          axis=1, keepdims=True)                      # (N, 1)
            d_cols.append(jnp.broadcast_to(lax.rsqrt(deg), (N_NODES, CHUNK)))
        d_scale = jnp.concatenate(d_cols, axis=1)                     # (N, E)

        # ---- propagation: D @ A @ D @ ego for ALL factors in one MXU call ---
        bd_rhs = sel * _tile_sublanes(d_scale * ego, FACTOR)          # (F*N, E)
        chunk = d_scale * jnp.dot(a_lhs, bd_rhs,
                                  preferred_element_type=jnp.float32)  # (N, E)

        @pl.when(last_iter)
        def _():
            emb_ref[...] = chunk                       # this iteration's chunks
            acc_ref[...] = acc_ref[...] + chunk        # become the layer output

        @pl.when(not_last_step)
        def _():
            # Per-edge attention update (dense form), ALL factors in one MXU call:
            #   val[:, f*N+j] = <normalize(chunk_f[i]), tanh(normalize(ego_f[j]))>
            # (the very last update has no observable effect -> skipped)
            h_cols, t_cols = [], []
            for f in range(FACTOR):
                cf = chunk[:, f * CHUNK:(f + 1) * CHUNK]
                ef = ego[:, f * CHUNK:(f + 1) * CHUNK]
                h_cols.append(jnp.broadcast_to(lax.rsqrt(jnp.maximum(
                    jnp.sum(cf * cf, axis=1, keepdims=True), 1e-24)),
                    (N_NODES, CHUNK)))
                t_cols.append(jnp.broadcast_to(lax.rsqrt(jnp.maximum(
                    jnp.sum(ef * ef, axis=1, keepdims=True), 1e-24)),
                    (N_NODES, CHUNK)))
            hn = chunk * jnp.concatenate(h_cols, axis=1)              # (N, E)
            tn = jnp.tanh(ego * jnp.concatenate(t_cols, axis=1))      # (N, E)
            bd_tn = sel * _tile_sublanes(tn, FACTOR)                  # (F*N, E)
            # Transpose folded into the MXU contraction (no materialized tn^T).
            val = lax.dot_general(hn, bd_tn, (((1,), (1,)), ((), ())),
                                  preferred_element_type=jnp.float32)  # (N, F*N)
            fv_ref[...] = fv_ref[...] + _tile_lanes(mask, FACTOR) * val

        return carry

    lax.fori_loop(0, total_steps, body, 0)

    out_ref[...] = acc_ref[...] * (1.0 / float(LAYER + 1))    # mean over layer stack


def dgcf_propagate(mask, emb0):
    """emb0: lane-dense embeddings (N, EMBED) -> light_out (N, EMBED)."""
    n, e = emb0.shape
    fn = FACTOR * n
    # Constant block-diagonal selector: block (f*N:(f+1)*N, f*C:(f+1)*C) = 1.
    rows = np.arange(fn)[:, None] // n
    cols = np.arange(e)[None, :] // CHUNK
    sel = jnp.asarray((rows == cols).astype(np.float32))
    return pl.pallas_call(
        _dgcf_kernel,
        out_shape=jax.ShapeDtypeStruct((n, e), jnp.float32),
        grid=(1,),
        in_specs=[
            pl.BlockSpec((n, n), lambda i: (0, 0)),
            pl.BlockSpec((fn, e), lambda i: (0, 0)),
            pl.BlockSpec((n, e), lambda i: (0, 0)),
        ],
        out_specs=pl.BlockSpec((n, e), lambda i: (0, 0)),
        scratch_shapes=[
            pltpu.VMEM((n, e), jnp.float32),    # emb: current layer input
            pltpu.VMEM((n, e), jnp.float32),    # acc: sum of layer outputs
            pltpu.VMEM((n, fn), jnp.float32),   # fv : per-factor edge logits
        ],
        compiler_params=pltpu.CompilerParams(
            dimension_semantics=("arbitrary",),
            vmem_limit_bytes=32 * 1024 * 1024,
        ),
    )(mask, sel, emb0)


# --------------------------------- wrapper ------------------------------------
def dgcf_forward(adj_mask, user_emb, item_emb, users, items):
    emb0 = jnp.concatenate([user_emb, item_emb], axis=0)     # (N, E) lane-dense
    light_out = dgcf_propagate(adj_mask, emb0)               # Pallas kernel, (N, E)
    all_users, all_items = light_out[:N_USER], light_out[N_USER:]
    # forward() scoring: gather + B*E elementwise row-sum -> plain JAX glue.
    return jnp.sum(all_users[users] * all_items[items], axis=1)


# --------------------------- reference (pure JAX) ------------------------------
def dgcf_reference(adj_mask, user_emb, item_emb, users, items):
    all_emb = jnp.concatenate([user_emb, item_emb], axis=0)
    fv = jnp.stack([adj_mask] * FACTOR, axis=0)          # ones on every edge
    embs = [all_emb]
    for _l in range(LAYER):
        ego = [all_emb[:, f * CHUNK:(f + 1) * CHUNK] for f in range(FACTOR)]
        chunks = None
        for _t in range(ITERATION):
            scores = jax.nn.softmax(fv, axis=0)
            new_chunks, upds = [], []
            for f in range(FACTOR):
                a = adj_mask * scores[f]
                deg = jnp.sum(a, axis=1, keepdims=True)
                d_inv = 1.0 / jnp.sqrt(deg)
                fe = d_inv * (a @ (d_inv * ego[f]))
                new_chunks.append(fe)
                hn = fe / jnp.sqrt(jnp.maximum(
                    jnp.sum(fe * fe, axis=1, keepdims=True), 1e-24))
                tn = jnp.tanh(ego[f] / jnp.sqrt(jnp.maximum(
                    jnp.sum(ego[f] * ego[f], axis=1, keepdims=True), 1e-24)))
                upds.append(adj_mask * (hn @ tn.T))
            fv = fv + jnp.stack(upds, axis=0)
            chunks = new_chunks
        all_emb = jnp.concatenate(chunks, axis=1)
        embs.append(all_emb)
    light_out = jnp.mean(jnp.stack(embs, axis=1), axis=1)
    all_users, all_items = light_out[:N_USER], light_out[N_USER:]
    return jnp.sum(all_users[users] * all_items[items], axis=1)


# --------------------------- deterministic setup -------------------------------
def build_adj_mask(key):
    """Dense 0/1 bipartite user-item adjacency (no isolated nodes)."""
    r = (jax.random.uniform(key, (N_USER, N_ITEM)) < 0.3).astype(jnp.float32)
    r = r.at[:, 0].set(1.0)
    r = r.at[0, :].set(1.0)
    adj = jnp.zeros((N_NODES, N_NODES), jnp.float32)
    adj = adj.at[:N_USER, N_USER:].set(r)
    adj = adj.at[N_USER:, :N_USER].set(r.T)
    return adj


if __name__ == "__main__":
    key = jax.random.PRNGKey(0)
    k_g, k_u, k_i, k_uid, k_iid = jax.random.split(key, 5)

    adj_mask = build_adj_mask(k_g)
    # nn.init.normal_(std=0.1) equivalents
    user_emb = 0.1 * jax.random.normal(k_u, (N_USER, EMBED), jnp.float32)
    item_emb = 0.1 * jax.random.normal(k_i, (N_ITEM, EMBED), jnp.float32)
    users = jax.random.randint(k_uid, (BATCH,), 0, N_USER)
    items = jax.random.randint(k_iid, (BATCH,), 0, N_ITEM)

    fwd = jax.jit(dgcf_forward)
    scores = jax.block_until_ready(fwd(adj_mask, user_emb, item_emb, users, items))

    ref = dgcf_reference(adj_mask, user_emb, item_emb, users, items)
    np.testing.assert_allclose(np.asarray(scores), np.asarray(ref),
                               rtol=1e-4, atol=1e-5)

    print("KERNEL_OK")
</pallas_src>

<mosaic_0001>
module attributes {stable_mosaic.version = 11 : i64} {
  func.func @_dgcf_kernel(%arg0: i32, %arg1: memref<32x32xf32, #tpu.memory_space<vmem>>, %arg2: memref<128x128xf32, #tpu.memory_space<vmem>>, %arg3: memref<32x128xf32, #tpu.memory_space<vmem>>, %arg4: memref<32x128xf32, #tpu.memory_space<vmem>>, %arg5: memref<32x128xf32, #tpu.memory_space<vmem>>, %arg6: memref<32x128xf32, #tpu.memory_space<vmem>>, %arg7: memref<32x128xf32, #tpu.memory_space<vmem>>) attributes {dimension_semantics = [#tpu.dimension_semantics<arbitrary>], iteration_bounds = array<i64: 1>, scalar_prefetch = 0 : i64, scratch_operands = 3 : i64, tpu.core_type = #tpu.core_type<tc>, window_params = [{pipeline_mode = #tpu.pipeline_mode<synchronous>, transform_indices = @transform_0, window_bounds = array<i64: 32, 32>}, {pipeline_mode = #tpu.pipeline_mode<synchronous>, transform_indices = @transform_1, window_bounds = array<i64: 128, 128>}, {pipeline_mode = #tpu.pipeline_mode<synchronous>, transform_indices = @transform_2, window_bounds = array<i64: 32, 128>}, {pipeline_mode = #tpu.pipeline_mode<synchronous>, transform_indices = @transform_3, window_bounds = array<i64: 32, 128>}]} {
    %c0 = arith.constant 0 : index
    %c0_0 = arith.constant 0 : index
    %0 = vector.load %arg3[%c0, %c0_0] : memref<32x128xf32, #tpu.memory_space<vmem>>, vector<32x128xf32>
    %c0_1 = arith.constant 0 : index
    %c0_2 = arith.constant 0 : index
    %1 = vector.load %arg5[%c0_1, %c0_2] : memref<32x128xf32, #tpu.memory_space<vmem>>, vector<32x128xf32>
    tpu.vector_store %arg5[%c0_1, %c0_2], %0 {strides = array<i32>} : memref<32x128xf32, #tpu.memory_space<vmem>>, vector<32x128xf32>,
    %c0_3 = arith.constant 0 : index
    %c0_4 = arith.constant 0 : index
    %2 = vector.load %arg3[%c0_3, %c0_4] : memref<32x128xf32, #tpu.memory_space<vmem>>, vector<32x128xf32>
    %c0_5 = arith.constant 0 : index
    %c0_6 = arith.constant 0 : index
    %3 = vector.load %arg6[%c0_5, %c0_6] : memref<32x128xf32, #tpu.memory_space<vmem>>, vector<32x128xf32>
    tpu.vector_store %arg6[%c0_5, %c0_6], %2 {strides = array<i32>} : memref<32x128xf32, #tpu.memory_space<vmem>>, vector<32x128xf32>,
    %c0_7 = arith.constant 0 : index
    %c0_8 = arith.constant 0 : index
    %4 = vector.load %arg1[%c0_7, %c0_8] : memref<32x32xf32, #tpu.memory_space<vmem>>, vector<32x32xf32>
    %5 = tpu.concatenate %4, %4, %4, %4 in 1 : vector<32x32xf32>, vector<32x32xf32>, vector<32x32xf32>, vector<32x32xf32> -> vector<32x128xf32>
    %c0_9 = arith.constant 0 : index
    %c0_10 = arith.constant 0 : index
    %6 = vector.load %arg7[%c0_9, %c0_10] : memref<32x128xf32, #tpu.memory_space<vmem>>, vector<32x128xf32>
    tpu.vector_store %arg7[%c0_9, %c0_10], %5 {strides = array<i32>} : memref<32x128xf32, #tpu.memory_space<vmem>>, vector<32x128xf32>,
    %c0_i32 = arith.constant 0 : i32
    %c4_i32 = arith.constant 4 : i32
    %7 = arith.addi %c0_i32, %c4_i32 : i32
    %c1_i32 = arith.constant 1 : i32
    scf.for %arg8 = %c0_i32 to %7 step %c1_i32  : i32 {
      %c2_i32 = arith.constant 2 : i32
      %c0_i32_16 = arith.constant 0 : i32
      %12 = arith.cmpi eq, %c2_i32, %c0_i32_16 : i32
      %c1_i32_17 = arith.constant 1 : i32
      %13 = arith.select %12, %c1_i32_17, %c2_i32 : i32
      %14 = arith.remsi %arg8, %13 : i32
      %c0_i32_18 = arith.constant 0 : i32
      %15 = arith.cmpi ne, %14, %c0_i32_18 : i32
      %c0_i32_19 = arith.constant 0 : i32
      %16 = arith.cmpi slt, %14, %c0_i32_19 : i32
      %c0_i32_20 = arith.constant 0 : i32
      %17 = arith.cmpi slt, %13, %c0_i32_20 : i32
      %18 = arith.xori %16, %17 : i1
      %19 = arith.andi %18, %15 : i1
      %20 = arith.addi %14, %13 : i32
      %21 = arith.select %19, %20, %14 : i32
      %c1_i32_21 = arith.constant 1 : i32
      %22 = arith.cmpi eq, %21, %c1_i32_21 : i32
      %c3_i32 = arith.constant 3 : i32
      %23 = arith.cmpi slt, %arg8, %c3_i32 : i32
      %c0_22 = arith.constant 0 : index
      %c0_23 = arith.constant 0 : index
      %24 = vector.load %arg1[%c0_22, %c0_23] : memref<32x32xf32, #tpu.memory_space<vmem>>, vector<32x32xf32>
      %c0_24 = arith.constant 0 : index
      %c0_25 = arith.constant 0 : index
      %25 = vector.load %arg2[%c0_24, %c0_25] : memref<128x128xf32, #tpu.memory_space<vmem>>, vector<128x128xf32>
      %c0_26 = arith.constant 0 : index
      %c0_27 = arith.constant 0 : index
      %26 = vector.load %arg5[%c0_26, %c0_27] : memref<32x128xf32, #tpu.memory_space<vmem>>, vector<32x128xf32>
      %c0_28 = arith.constant 0 : index
      %c0_29 = arith.constant 0 : index
      %27 = vector.load %arg7[%c0_28, %c0_29] : memref<32x128xf32, #tpu.memory_space<vmem>>, vector<32x128xf32>
      %28 = math.exp %27 : vector<32x128xf32>
      %29 = vector.extract_strided_slice %28 {offsets = [0, 0], sizes = [32, 32], strides = [1, 1]} : vector<32x128xf32> to vector<32x32xf32>
      %30 = vector.extract_strided_slice %28 {offsets = [0, 32], sizes = [32, 32], strides = [1, 1]} : vector<32x128xf32> to vector<32x32xf32>
      %31 = arith.addf %29, %30 : vector<32x32xf32>
      %32 = vector.extract_strided_slice %28 {offsets = [0, 64], sizes = [32, 32], strides = [1, 1]} : vector<32x128xf32> to vector<32x32xf32>
      %33 = arith.addf %31, %32 : vector<32x32xf32>
      %34 = vector.extract_strided_slice %28 {offsets = [0, 96], sizes = [32, 32], strides = [1, 1]} : vector<32x128xf32> to vector<32x32xf32>
      %35 = arith.addf %33, %34 : vector<32x32xf32>
      %36 = tpu.reciprocal %35 {approx = true} : vector<32x32xf32> -> vector<32x32xf32>
      %37 = arith.mulf %35, %36 : vector<32x32xf32>
      %cst_30 = arith.constant 2.000000e+00 : f32
      %38 = vector.broadcast %cst_30 : f32 to vector<32x32xf32>
      %39 = arith.subf %38, %37 : vector<32x32xf32>
      %40 = arith.mulf %36, %39 : vector<32x32xf32>
      %41 = arith.mulf %24, %40 : vector<32x32xf32>
      %42 = tpu.concatenate %41, %41, %41, %41 in 1 : vector<32x32xf32>, vector<32x32xf32>, vector<32x32xf32>, vector<32x32xf32> -> vector<32x128xf32>
      %43 = arith.mulf %28, %42 : vector<32x128xf32>
      %44 = vector.extract_strided_slice %43 {offsets = [0, 0], sizes = [32, 32], strides = [1, 1]} : vector<32x128xf32> to vector<32x32xf32>
      %cst_31 = arith.constant dense<0.000000e+00> : vector<32xf32>
      %45 = vector.multi_reduction <add>, %44, %cst_31 [1] : vector<32x32xf32> to vector<32xf32>
      %46 = vector.shape_cast %45 : vector<32xf32> to vector<32x1xf32>
      %47 = math.rsqrt %46 : vector<32x1xf32>
      %48 = vector.shape_cast %47 : vector<32x1xf32> to vector<32x1xf32>
      %49 = vector.broadcast %48 : vector<32x1xf32> to vector<32x32xf32>
      %50 = vector.extract_strided_slice %43 {offsets = [0, 32], sizes = [32, 32], strides = [1, 1]} : vector<32x128xf32> to vector<32x32xf32>
      %cst_32 = arith.constant dense<0.000000e+00> : vector<32xf32>
      %51 = vector.multi_reduction <add>, %50, %cst_32 [1] : vector<32x32xf32> to vector<32xf32>
      %52 = vector.shape_cast %51 : vector<32xf32> to vector<32x1xf32>
      %53 = math.rsqrt %52 : vector<32x1xf32>
      %54 = vector.shape_cast %53 : vector<32x1xf32> to vector<32x1xf32>
      %55 = vector.broadcast %54 : vector<32x1xf32> to vector<32x32xf32>
      %56 = vector.extract_strided_slice %43 {offsets = [0, 64], sizes = [32, 32], strides = [1, 1]} : vector<32x128xf32> to vector<32x32xf32>
      %cst_33 = arith.constant dense<0.000000e+00> : vector<32xf32>
      %57 = vector.multi_reduction <add>, %56, %cst_33 [1] : vector<32x32xf32> to vector<32xf32>
      %58 = vector.shape_cast %57 : vector<32xf32> to vector<32x1xf32>
      %59 = math.rsqrt %58 : vector<32x1xf32>
      %60 = vector.shape_cast %59 : vector<32x1xf32> to vector<32x1xf32>
      %61 = vector.broadcast %60 : vector<32x1xf32> to vector<32x32xf32>
      %62 = vector.extract_strided_slice %43 {offsets = [0, 96], sizes = [32, 32], strides = [1, 1]} : vector<32x128xf32> to vector<32x32xf32>
      %cst_34 = arith.constant dense<0.000000e+00> : vector<32xf32>
      %63 = vector.multi_reduction <add>, %62, %cst_34 [1] : vector<32x32xf32> to vector<32xf32>
      %64 = vector.shape_cast %63 : vector<32xf32> to vector<32x1xf32>
      %65 = math.rsqrt %64 : vector<32x1xf32>
      %66 = vector.shape_cast %65 : vector<32x1xf32> to vector<32x1xf32>
      %67 = vector.broadcast %66 : vector<32x1xf32> to vector<32x32xf32>
      %68 = tpu.concatenate %49, %55, %61, %67 in 1 : vector<32x32xf32>, vector<32x32xf32>, vector<32x32xf32>, vector<32x32xf32> -> vector<32x128xf32>
      %69 = arith.mulf %68, %26 : vector<32x128xf32>
      %70 = tpu.concatenate %69, %69, %69, %69 in 0 : vector<32x128xf32>, vector<32x128xf32>, vector<32x128xf32>, vector<32x128xf32> -> vector<128x128xf32>
      %71 = arith.mulf %25, %70 : vector<128x128xf32>
      %cst_35 = arith.constant dense<0.000000e+00> : vector<32x128xf32>
      %72 = tpu.matmul %43, %71, %cst_35 {dimension_numbers = #tpu.dot_dimension_numbers<[1], [0], [0], [1], [0, 0, 1, 1], [], []>} : vector<32x128xf32>, vector<128x128xf32>, vector<32x128xf32> -> vector<32x128xf32>
      %73 = arith.mulf %68, %72 : vector<32x128xf32>
      %74 = arith.extui %22 : i1 to i32
      %c0_i32_36 = arith.constant 0 : i32
      %75 = arith.cmpi ne, %74, %c0_i32_36 : i32
      scf.if %75 {
        %c0_38 = arith.constant 0 : index
        %c0_39 = arith.constant 0 : index
        %78 = vector.load %arg5[%c0_38, %c0_39] : memref<32x128xf32, #tpu.memory_space<vmem>>, vector<32x128xf32>
        tpu.vector_store %arg5[%c0_38, %c0_39], %73 {strides = array<i32>} : memref<32x128xf32, #tpu.memory_space<vmem>>, vector<32x128xf32>,
        %c0_40 = arith.constant 0 : index
        %c0_41 = arith.constant 0 : index
        %79 = vector.load %arg6[%c0_40, %c0_41] : memref<32x128xf32, #tpu.memory_space<vmem>>, vector<32x128xf32>
        %80 = arith.addf %79, %73 : vector<32x128xf32>
        %c0_42 = arith.constant 0 : index
        %c0_43 = arith.constant 0 : index
        %81 = vector.load %arg6[%c0_42, %c0_43] : memref<32x128xf32, #tpu.memory_space<vmem>>, vector<32x128xf32>
        tpu.vector_store %arg6[%c0_42, %c0_43], %80 {strides = array<i32>} : memref<32x128xf32, #tpu.memory_space<vmem>>, vector<32x128xf32>,
      } else {
      }
      %76 = arith.extui %23 : i1 to i32
      %c0_i32_37 = arith.constant 0 : i32
      %77 = arith.cmpi ne, %76, %c0_i32_37 : i32
      scf.if %77 {
        %78 = vector.extract_strided_slice %73 {offsets = [0, 0], sizes = [32, 32], strides = [1, 1]} : vector<32x128xf32> to vector<32x32xf32>
        %79 = vector.extract_strided_slice %26 {offsets = [0, 0], sizes = [32, 32], strides = [1, 1]} : vector<32x128xf32> to vector<32x32xf32>
        %80 = arith.mulf %78, %78 : vector<32x32xf32>
        %cst_38 = arith.constant dense<0.000000e+00> : vector<32xf32>
        %81 = vector.multi_reduction <add>, %80, %cst_38 [1] : vector<32x32xf32> to vector<32xf32>
        %82 = vector.shape_cast %81 : vector<32xf32> to vector<32x1xf32>
        %cst_39 = arith.constant 1.000000e-24 : f32
        %83 = vector.broadcast %cst_39 : f32 to vector<32x1xf32>
        %84 = arith.maximumf %82, %83 : vector<32x1xf32>
        %85 = math.rsqrt %84 : vector<32x1xf32>
        %86 = vector.shape_cast %85 : vector<32x1xf32> to vector<32x1xf32>
        %87 = vector.broadcast %86 : vector<32x1xf32> to vector<32x32xf32>
        %88 = arith.mulf %79, %79 : vector<32x32xf32>
        %cst_40 = arith.constant dense<0.000000e+00> : vector<32xf32>
        %89 = vector.multi_reduction <add>, %88, %cst_40 [1] : vector<32x32xf32> to vector<32xf32>
        %90 = vector.shape_cast %89 : vector<32xf32> to vector<32x1xf32>
        %cst_41 = arith.constant 1.000000e-24 : f32
        %91 = vector.broadcast %cst_41 : f32 to vector<32x1xf32>
        %92 = arith.maximumf %90, %91 : vector<32x1xf32>
        %93 = math.rsqrt %92 : vector<32x1xf32>
        %94 = vector.shape_cast %93 : vector<32x1xf32> to vector<32x1xf32>
        %95 = vector.broadcast %94 : vector<32x1xf32> to vector<32x32xf32>
        %96 = vector.extract_strided_slice %73 {offsets = [0, 32], sizes = [32, 32], strides = [1, 1]} : vector<32x128xf32> to vector<32x32xf32>
        %97 = vector.extract_strided_slice %26 {offsets = [0, 32], sizes = [32, 32], strides = [1, 1]} : vector<32x128xf32> to vector<32x32xf32>
        %98 = arith.mulf %96, %96 : vector<32x32xf32>
        %cst_42 = arith.constant dense<0.000000e+00> : vector<32xf32>
        %99 = vector.multi_reduction <add>, %98, %cst_42 [1] : vector<32x32xf32> to vector<32xf32>
        %100 = vector.shape_cast %99 : vector<32xf32> to vector<32x1xf32>
        %cst_43 = arith.constant 1.000000e-24 : f32
        %101 = vector.broadcast %cst_43 : f32 to vector<32x1xf32>
        %102 = arith.maximumf %100, %101 : vector<32x1xf32>
        %103 = math.rsqrt %102 : vector<32x1xf32>
        %104 = vector.shape_cast %103 : vector<32x1xf32> to vector<32x1xf32>
        %105 = vector.broadcast %104 : vector<32x1xf32> to vector<32x32xf32>
        %106 = arith.mulf %97, %97 : vector<32x32xf32>
        %cst_44 = arith.constant dense<0.000000e+00> : vector<32xf32>
        %107 = vector.multi_reduction <add>, %106, %cst_44 [1] : vector<32x32xf32> to vector<32xf32>
        %108 = vector.shape_cast %107 : vector<32xf32> to vector<32x1xf32>
        %cst_45 = arith.constant 1.000000e-24 : f32
        %109 = vector.broadcast %cst_45 : f32 to vector<32x1xf32>
        %110 = arith.maximumf %108, %109 : vector<32x1xf32>
        %111 = math.rsqrt %110 : vector<32x1xf32>
        %112 = vector.shape_cast %111 : vector<32x1xf32> to vector<32x1xf32>
        %113 = vector.broadcast %112 : vector<32x1xf32> to vector<32x32xf32>
        %114 = vector.extract_strided_slice %73 {offsets = [0, 64], sizes = [32, 32], strides = [1, 1]} : vector<32x128xf32> to vector<32x32xf32>
        %115 = vector.extract_strided_slice %26 {offsets = [0, 64], sizes = [32, 32], strides = [1, 1]} : vector<32x128xf32> to vector<32x32xf32>
        %116 = arith.mulf %114, %114 : vector<32x32xf32>
        %cst_46 = arith.constant dense<0.000000e+00> : vector<32xf32>
        %117 = vector.multi_reduction <add>, %116, %cst_46 [1] : vector<32x32xf32> to vector<32xf32>
        %118 = vector.shape_cast %117 : vector<32xf32> to vector<32x1xf32>
        %cst_47 = arith.constant 1.000000e-24 : f32
        %119 = vector.broadcast %cst_47 : f32 to vector<32x1xf32>
        %120 = arith.maximumf %118, %119 : vector<32x1xf32>
        %121 = math.rsqrt %120 : vector<32x1xf32>
        %122 = vector.shape_cast %121 : vector<32x1xf32> to vector<32x1xf32>
        %123 = vector.broadcast %122 : vector<32x1xf32> to vector<32x32xf32>
        %124 = arith.mulf %115, %115 : vector<32x32xf32>
        %cst_48 = arith.constant dense<0.000000e+00> : vector<32xf32>
        %125 = vector.multi_reduction <add>, %124, %cst_48 [1] : vector<32x32xf32> to vector<32xf32>
        %126 = vector.shape_cast %125 : vector<32xf32> to vector<32x1xf32>
        %cst_49 = arith.constant 1.000000e-24 : f32
        %127 = vector.broadcast %cst_49 : f32 to vector<32x1xf32>
        %128 = arith.maximumf %126, %127 : vector<32x1xf32>
        %129 = math.rsqrt %128 : vector<32x1xf32>
        %130 = vector.shape_cast %129 : vector<32x1xf32> to vector<32x1xf32>
        %131 = vector.broadcast %130 : vector<32x1xf32> to vector<32x32xf32>
        %132 = vector.extract_strided_slice %73 {offsets = [0, 96], sizes = [32, 32], strides = [1, 1]} : vector<32x128xf32> to vector<32x32xf32>
        %133 = vector.extract_strided_slice %26 {offsets = [0, 96], sizes = [32, 32], strides = [1, 1]} : vector<32x128xf32> to vector<32x32xf32>
        %134 = arith.mulf %132, %132 : vector<32x32xf32>
        %cst_50 = arith.constant dense<0.000000e+00> : vector<32xf32>
        %135 = vector.multi_reduction <add>, %134, %cst_50 [1] : vector<32x32xf32> to vector<32xf32>
        %136 = vector.shape_cast %135 : vector<32xf32> to vector<32x1xf32>
        %cst_51 = arith.constant 1.000000e-24 : f32
        %137 = vector.broadcast %cst_51 : f32 to vector<32x1xf32>
        %138 = arith.maximumf %136, %137 : vector<32x1xf32>
        %139 = math.rsqrt %138 : vector<32x1xf32>
        %140 = vector.shape_cast %139 : vector<32x1xf32> to vector<32x1xf32>
        %141 = vector.broadcast %140 : vector<32x1xf32> to vector<32x32xf32>
        %142 = arith.mulf %133, %133 : vector<32x32xf32>
        %cst_52 = arith.constant dense<0.000000e+00> : vector<32xf32>
        %143 = vector.multi_reduction <add>, %142, %cst_52 [1] : vector<32x32xf32> to vector<32xf32>
        %144 = vector.shape_cast %143 : vector<32xf32> to vector<32x1xf32>
        %cst_53 = arith.constant 1.000000e-24 : f32
        %145 = vector.broadcast %cst_53 : f32 to vector<32x1xf32>
        %146 = arith.maximumf %144, %145 : vector<32x1xf32>
        %147 = math.rsqrt %146 : vector<32x1xf32>
        %148 = vector.shape_cast %147 : vector<32x1xf32> to vector<32x1xf32>
        %149 = vector.broadcast %148 : vector<32x1xf32> to vector<32x32xf32>
        %150 = tpu.concatenate %87, %105, %123, %141 in 1 : vector<32x32xf32>, vector<32x32xf32>, vector<32x32xf32>, vector<32x32xf32> -> vector<32x128xf32>
        %151 = arith.mulf %73, %150 : vector<32x128xf32>
        %152 = tpu.concatenate %95, %113, %131, %149 in 1 : vector<32x32xf32>, vector<32x32xf32>, vector<32x32xf32>, vector<32x32xf32> -> vector<32x128xf32>
        %153 = arith.mulf %26, %152 : vector<32x128xf32>
        %154 = math.tanh %153 : vector<32x128xf32>
        %155 = tpu.concatenate %154, %154, %154, %154 in 0 : vector<32x128xf32>, vector<32x128xf32>, vector<32x128xf32>, vector<32x128xf32> -> vector<128x128xf32>
        %156 = arith.mulf %25, %155 : vector<128x128xf32>
        %cst_54 = arith.constant dense<0.000000e+00> : vector<32x128xf32>
        %157 = tpu.matmul %151, %156, %cst_54 {dimension_numbers = #tpu.dot_dimension_numbers<[1], [1], [0], [0], [0, 0, 1, 0], [], []>} : vector<32x128xf32>, vector<128x128xf32>, vector<32x128xf32> -> vector<32x128xf32>
        %c0_55 = arith.constant 0 : index
        %c0_56 = arith.constant 0 : index
        %158 = vector.load %arg7[%c0_55, %c0_56] : memref<32x128xf32, #tpu.memory_space<vmem>>, vector<32x128xf32>
        %159 = tpu.concatenate %24, %24, %24, %24 in 1 : vector<32x32xf32>, vector<32x32xf32>, vector<32x32xf32>, vector<32x32xf32> -> vector<32x128xf32>
        %160 = arith.mulf %159, %157 : vector<32x128xf32>
        %161 = arith.addf %158, %160 : vector<32x128xf32>
        %c0_57 = arith.constant 0 : index
        %c0_58 = arith.constant 0 : index
        %162 = vector.load %arg7[%c0_57, %c0_58] : memref<32x128xf32, #tpu.memory_space<vmem>>, vector<32x128xf32>
        tpu.vector_store %arg7[%c0_57, %c0_58], %161 {strides = array<i32>} : memref<32x128xf32, #tpu.memory_space<vmem>>, vector<32x128xf32>,
      } else {
      }
    }
    %c4_i32_11 = arith.constant 4 : i32
    %c0_12 = arith.constant 0 : index
    %c0_13 = arith.constant 0 : index
    %8 = vector.load %arg6[%c0_12, %c0_13] : memref<32x128xf32, #tpu.memory_space<vmem>>, vector<32x128xf32>
    %cst = arith.constant 0.333333343 : f32
    %9 = vector.broadcast %cst : f32 to vector<32x128xf32>
    %10 = arith.mulf %8, %9 : vector<32x128xf32>
    %c0_14 = arith.constant 0 : index
    %c0_15 = arith.constant 0 : index
    %11 = vector.load %arg4[%c0_14, %c0_15] : memref<32x128xf32, #tpu.memory_space<vmem>>, vector<32x128xf32>
    tpu.vector_store %arg4[%c0_14, %c0_15], %10 {strides = array<i32>} : memref<32x128xf32, #tpu.memory_space<vmem>>, vector<32x128xf32>,
    return
  }
  func.func @transform_0(%arg0: i32) -> (i32, i32) {
    %c0_i32 = arith.constant 0 : i32
    %c0_i32_0 = arith.constant 0 : i32
    %c0_i32_1 = arith.constant 0 : i32
    return %c0_i32, %c0_i32_0 : i32, i32
  }
  func.func @transform_1(%arg0: i32) -> (i32, i32) {
    %c0_i32 = arith.constant 0 : i32
    %c0_i32_0 = arith.constant 0 : i32
    %c0_i32_1 = arith.constant 0 : i32
    return %c0_i32, %c0_i32_0 : i32, i32
  }
  func.func @transform_2(%arg0: i32) -> (i32, i32) {
    %c0_i32 = arith.constant 0 : i32
    %c0_i32_0 = arith.constant 0 : i32
    %c0_i32_1 = arith.constant 0 : i32
    return %c0_i32, %c0_i32_0 : i32, i32
  }
  func.func @transform_3(%arg0: i32) -> (i32, i32) {
    %c0_i32 = arith.constant 0 : i32
    %c0_i32_0 = arith.constant 0 : i32
    %c0_i32_1 = arith.constant 0 : i32
    return %c0_i32, %c0_i32_0 : i32, i32
  }
}

</mosaic_0001>

<bundles_post_ra>
// kernel: dgcf_forward.1
= control target key start
LH: loop header
LB: loop body
LE: loop exit
PB: predicated region body
PF: predicated region fallthrough
CT: control target
= control target key end

     0   :  { %8 = vsyncpa [#allocation6], 0  ;;  %s1402_s12 = smov [#allocation5]   ;;  %s1939_s0 = inlined_call_operand.vmem [shape: f32[32,32], index: 0, kind: input, shape index: {}]   ;;  %s1940_s1 = inlined_call_operand.hbm [shape: f32[128,128], index: 1, kind: input, shape index: {}]   ;;  %s1941_s2 = inlined_call_operand.vmem [shape: f32[32,128], index: 2, kind: input, shape index: {}]   ;;  %s1942_s3 = inlined_call_operand.vmem [shape: f32[32,128], index: 3, kind: output, shape index: {}]  }
   0x1   :  { %s16_s13 = sshll.u32 %s1402_s12, 4  ;;  %s1370_s16 = scalar_lea.hbm %s1940_s1, 2048  ;;  %s17_s13 = int_to_ptr.vmem [resolvable:$true] %s16_s13 }
   0x2   :  { %p1371_p0 = scmp.ne.s32.totalorder %s1940_s1, %s1370_s16  ;;  %p1374_p1 = scmp.lt.u32.totalorder %s1370_s16, %s1940_s1 }
   0x4   :  { %p1376_p2 = pnand %p1374_p1, %p1371_p0 }
   0x6   :  { %1379 = shalt.err (!%p1376_p2)
}
   0x7   :  { %s1380_s21 = scalar_lea.vmem %s17_s13, 2048  ;;  %p1385_p4 = scmp.lt.s32.totalorder %s17_s13, %s17_s13 }
   0x8   :  { %p1381_p3 = scmp.ne.s32.totalorder %s17_s13, %s1380_s21  ;;  %p1386_p5 = scmp.lt.s32.totalorder %s1380_s21, %s1380_s21 }
   0xa   :  { %p1387_p6 = por %p1386_p5, %p1385_p4 }
   0xc   :  { %p1388_p7 = pnand %p1387_p6, %p1381_p3 }
   0xe   :  { %1391 = shalt.err (!%p1388_p7)
}
   0xf   :  { %s1403_s22 = smov 128   ;;  %s1404_s23 = smov 8  }
  0x10   :  { %22 = dma.hbm_to_vmem [thread:$0]  %s1940_s1, 2048, %s17_s13, [#allocation6], %s1403_s22, %s1403_s22, %s1404_s23  }
  0x11   :  { %1396 = dma.done.wait [#allocation6], 2048  }
  0x12   :  { %1397 = vsyncadd [#allocation6], 4294965248  ;;  %v28_v0 = vld [vmem:[%s1941_s2] sm:$0xff]  ;;  %v29_v1 = vld [vmem:[%s1941_s2 + $0x8] sm:$0xff]  ;;  %s1405_s10 = smov 32   ;;  %s1406_s14 = smov 64  }
  0x13   :  { %v30_v2 = vld [vmem:[%s1941_s2 + $0x10] sm:$0xff]  ;;  %v31_v3 = vld [vmem:[%s1941_s2 + $0x18] sm:$0xff]  ;;  %32 = vst [vmem:[#allocation2] sm:$0xff] %v28_v0  ;;  %33 = vst [vmem:[#allocation2 + $0x8] sm:$0xff] %v29_v1  ;;  %s1407_s15 = smov 96   ;;  %vm88_vm0 = vcmask 261120  }
  0x14   :  { %34 = vst [vmem:[#allocation2 + $0x10] sm:$0xff] %v30_v2  ;;  %40 = vst [vmem:[#allocation3] sm:$0xff] %v28_v0  ;;  %v46_v4 = vld [vmem:[%s1939_s0 + $0x10] sm:$0xff]  ;;  %v44_v5 = vld [vmem:[%s1939_s0] sm:$0xff]  ;;  %vm93_vm1 = vcmask 523264   ;;  %vm98_vm2 = vcmask 785408  }
  0x15   :  { %41 = vst [vmem:[#allocation3 + $0x8] sm:$0xff] %v29_v1  ;;  %42 = vst [vmem:[#allocation3 + $0x10] sm:$0xff] %v30_v2  ;;  %56 = vrot.lane.b32.xlu1 %v46_v4, %s1405_s10  ;;  %52 = vrot.lane.b32.xlu0 %v44_v5, %s1405_s10  ;;  %v47_v6 = vld [vmem:[%s1939_s0 + $0x18] sm:$0xff]  ;;  %v45_v7 = vld [vmem:[%s1939_s0 + $0x8] sm:$0xff]  ;;  %s1482_s16 = smov 0  }
  0x16   :  { %35 = vst [vmem:[#allocation2 + $0x18] sm:$0xff] %v31_v3  ;;  %43 = vst [vmem:[#allocation3 + $0x18] sm:$0xff] %v31_v3 }
  0x19   :  { %58 = vrot.lane.b32.xlu1 %v47_v6, %s1405_s10  ;;  %54 = vrot.lane.b32.xlu0 %v45_v7, %s1405_s10 }
  0x1d   :  { %66 = vrot.lane.b32.xlu1 %v45_v7, %s1406_s14  ;;  %64 = vrot.lane.b32.xlu0 %v44_v5, %s1406_s14 }
  0x21   :  { %70 = vrot.lane.b32.xlu1 %v47_v6, %s1406_s14  ;;  %68 = vrot.lane.b32.xlu0 %v46_v4, %s1406_s14 }
  0x25   :  { %78 = vrot.lane.b32.xlu1 %v45_v7, %s1407_s15  ;;  %76 = vrot.lane.b32.xlu0 %v44_v5, %s1407_s15 }
  0x29   :  { %82 = vrot.lane.b32.xlu1 %v47_v6, %s1407_s15  ;;  %80 = vrot.lane.b32.xlu0 %v46_v4, %s1407_s15 }
  0x87   :  { %v57_v8 = vpop.permute.xlu1 %56  ;;  %v53_v9 = vpop.permute.xlu0 %52 }
  0x88   :  { %v89_v16 = vsel %vm88_vm0, %v44_v5, %v53_v9  ;;  %v91_v24 = vsel %vm88_vm0, %v46_v4, %v57_v8 }
  0x8b   :  { %v59_v10 = vpop.permute.xlu1 %58  ;;  %v55_v11 = vpop.permute.xlu0 %54 }
  0x8c   :  { %v90_v17 = vsel %vm88_vm0, %v45_v7, %v55_v11  ;;  %v92_v25 = vsel %vm88_vm0, %v47_v6, %v59_v10 }
  0x8f   :  { %v67_v12 = vpop.permute.xlu1 %66  ;;  %v65_v13 = vpop.permute.xlu0 %64 }
  0x90   :  { %v95_v18 = vsel %vm93_vm1, %v90_v17, %v67_v12  ;;  %v94_v19 = vsel %vm93_vm1, %v89_v16, %v65_v13 }
  0x93   :  { %v71_v14 = vpop.permute.xlu1 %70  ;;  %v69_v15 = vpop.permute.xlu0 %68 }
  0x94   :  { %v97_v26 = vsel %vm93_vm1, %v92_v25, %v71_v14  ;;  %v96_v27 = vsel %vm93_vm1, %v91_v24, %v69_v15 }
  0x97   :  { %v79_v20 = vpop.permute.xlu1 %78  ;;  %v77_v21 = vpop.permute.xlu0 %76 }
  0x98   :  { %v100_v22 = vsel %vm98_vm2, %v95_v18, %v79_v20  ;;  %v99_v23 = vsel %vm98_vm2, %v94_v19, %v77_v21 }
  0x99   :  { %104 = vst [vmem:[#allocation4 + $0x8] sm:$0xff] %v100_v22  ;;  %103 = vst [vmem:[#allocation4] sm:$0xff] %v99_v23 }
  0x9b   :  { %v83_v28 = vpop.permute.xlu1 %82  ;;  %v81_v29 = vpop.permute.xlu0 %80 }
  0x9c   :  { %v102_v30 = vsel %vm98_vm2, %v97_v26, %v83_v28  ;;  %v101_v31 = vsel %vm98_vm2, %v96_v27, %v81_v29 }
  0x9d   :  { %106 = vst [vmem:[#allocation4 + $0x18] sm:$0xff] %v102_v30  ;;  %105 = vst [vmem:[#allocation4 + $0x10] sm:$0xff] %v101_v31 }
  0x9e LB: > { %s1408_s17 = smov 64   ;;  %s1409_s18 = smov 96   ;;  %v1526_v9 = vld [vmem:[%s1939_s0 + $0x8] sm:$0xff]  ;;  %v1531_v12 = vld [vmem:[%s1939_s0] sm:$0xff]  ;;  %v1542_v23 = vld [vmem:[%s1939_s0 + $0x18] sm:$0xff]  ;;  %s1400_s16 = sphi %s1482_s16, %s112_s16  }
  0x9f   : > { %s1410_s19 = smov 32   ;;  %v1547_v25 = vld [vmem:[%s1939_s0 + $0x10] sm:$0xff]  ;;  %p113_p8 = scmp.lt.s32.totalorder %s1400_s16, 0 }
  0xa0   : > { %v151_v32 = vld [vmem:[#allocation4] sm:$0xff]  ;;  %v152_v33 = vld [vmem:[#allocation4 + $0x8] sm:$0xff]  ;;  %s114_s28 = ssub.s32 0, %s1400_s16 }
  0xa1   : > { %v155_v34 = vmul.f32 1.442695, %v151_v32  ;;  %v157_v35 = vmul.f32 1.442695, %v152_v33  ;;  %s1013_s29 = smin.u32 %s1400_s16, %s114_s28 }
  0xa2   : > { %s116_s30 = sand.u32 1, %s1013_s29  }
  0xa3   : > { %1250 = vpow2.f32 %v155_v34  ;;  %s117_s4 = ssub.s32 0, %s116_s30 }
  0xa4   : > { %v154_v36 = vld [vmem:[#allocation4 + $0x18] sm:$0xff]  ;;  %v153_v37 = vld [vmem:[#allocation4 + $0x10] sm:$0xff]  ;;  %1252 = vpow2.f32 %v157_v35  ;;  %s1944_s4 = smov (!%p113_p8, %s117_s4), %s116_s30 }
  0xa5   : > { %v161_v38 = vmul.f32 1.442695, %v154_v36  ;;  %v159_v39 = vmul.f32 1.442695, %v153_v37  ;;  %p1015_p9 = scmp.lt.s32.totalorder %s1944_s4, 0  ;;  %s123_s5 = sadd.s32 2, %s1944_s4 }
  0xa7   : > { %1254 = vpow2.f32 %v161_v38  ;;  %s1946_s5 = smov (!%p1015_p9, %s123_s5), %s1944_s4 }
  0xa8   : > { %1256 = vpow2.f32 %v159_v39  ;;  %p1016_p10 = scmp.ne.s32.totalorder %s1946_s5, 1 }
  0xad   : > { %v1487_v40 = vpop.eup %1250 }
  0xae   : > { %183 = vrot.lane.b32.xlu1 %v1487_v40, %s1408_s17  ;;  %167 = vrot.lane.b32.xlu0 %v1487_v40, %s1409_s18  ;;  %v1493_v41 = vpop.eup %1252 }
  0xb1   : > { %v1495_v42 = vpop.eup %1254 }
  0xb2   : > { %185 = vrot.lane.b32.xlu1 %v1493_v41, %s1408_s17  ;;  %169 = vrot.lane.b32.xlu0 %v1493_v41, %s1409_s18  ;;  %v1501_v43 = vpop.eup %1256 }
  0xb6   : > { %173 = vrot.lane.b32.xlu1 %v1495_v42, %s1409_s18  ;;  %171 = vrot.lane.b32.xlu0 %v1501_v43, %s1409_s18 }
  0xba   : > { %201 = vrot.lane.b32.xlu1 %v1493_v41, %s1410_s19  ;;  %199 = vrot.lane.b32.xlu0 %v1487_v40, %s1410_s19 }
  0xbe   : > { %189 = vrot.lane.b32.xlu1 %v1495_v42, %s1408_s17  ;;  %187 = vrot.lane.b32.xlu0 %v1501_v43, %s1408_s17 }
  0xc2   : > { %205 = vrot.lane.b32.xlu1 %v1495_v42, %s1410_s19  ;;  %203 = vrot.lane.b32.xlu0 %v1501_v43, %s1410_s19 }
 0x120   : > { %v184_v44 = vpop.permute.xlu1 %183  ;;  %v168_v45 = vpop.permute.xlu0 %167 }
 0x121   : > { %v179_v48 = vadd.f32 %v1487_v40, %v168_v45 }
 0x123   : > { %v195_v53 = vadd.f32 %v184_v44, %v179_v48 }
 0x124   : > { %v186_v46 = vpop.permute.xlu1 %185  ;;  %v170_v47 = vpop.permute.xlu0 %169 }
 0x125   : > { %v180_v49 = vadd.f32 %v1493_v41, %v170_v47 }
 0x127   : > { %v196_v52 = vadd.f32 %v186_v46, %v180_v49 }
 0x128   : > { %v174_v50 = vpop.permute.xlu1 %173  ;;  %v172_v51 = vpop.permute.xlu0 %171 }
 0x129   : > { %v182_v60 = vadd.f32 %v1495_v42, %v174_v50  ;;  %v181_v61 = vadd.f32 %v1501_v43, %v172_v51 }
 0x12c   : > { %v202_v54 = vpop.permute.xlu1 %201  ;;  %v200_v55 = vpop.permute.xlu0 %199 }
 0x12d   : > { %v212_v56 = vadd.f32 %v202_v54, %v196_v52  ;;  %v211_v57 = vadd.f32 %v200_v55, %v195_v53 }
 0x12f   : > { %1258 = vrcp.f32 %v212_v56 }
 0x130   : > { %1260 = vrcp.f32 %v211_v57  ;;  %v190_v58 = vpop.permute.xlu1 %189  ;;  %v188_v59 = vpop.permute.xlu0 %187 }
 0x131   : > { %v198_v62 = vadd.f32 %v190_v58, %v182_v60  ;;  %v197_v63 = vadd.f32 %v188_v59, %v181_v61 }
 0x134   : > { %v206_v0 = vpop.permute.xlu1 %205  ;;  %v204_v1 = vpop.permute.xlu0 %203 }
 0x135   : > { %v214_v2 = vadd.f32 %v206_v0, %v198_v62  ;;  %v213_v3 = vadd.f32 %v204_v1, %v197_v63 }
 0x137   : > { %1262 = vrcp.f32 %v214_v2 }
 0x138   : > { %1264 = vrcp.f32 %v213_v3 }
 0x139   : > { %v1259_v4 = vpop.eup %1258 }
 0x13a   : > { %v1261_v5 = vpop.eup %1260  ;;  %v220_v6 = vmul.f32 %v1259_v4, %v212_v56 }
 0x13b   : > { %v219_v7 = vmul.f32 %v1261_v5, %v211_v57 }
 0x13c   : > { %v224_v8 = vsub.f32 2.0, %v220_v6 }
 0x13d   : > { %v223_v10 = vsub.f32 2.0, %v219_v7 }
 0x13e   : > { %v228_v11 = vmul.f32 %v1259_v4, %v224_v8 }
 0x13f   : > { %v227_v13 = vmul.f32 %v1261_v5, %v223_v10 }
 0x140   : > { %v232_v14 = vmul.f32 %v228_v11, %v1526_v9 }
 0x141   : > { %v1263_v15 = vpop.eup %1262  ;;  %v231_v16 = vmul.f32 %v227_v13, %v1531_v12 }
 0x142   : > { %v1265_v17 = vpop.eup %1264  ;;  %v222_v18 = vmul.f32 %v1263_v15, %v214_v2  ;;  %241 = vrot.lane.b32.xlu1 %v232_v14, %s1410_s19 }
 0x143   : > { %v221_v19 = vmul.f32 %v1265_v17, %v213_v3  ;;  %239 = vrot.lane.b32.xlu0 %v231_v16, %s1410_s19 }
 0x144   : > { %v226_v20 = vsub.f32 2.0, %v222_v18 }
 0x145   : > { %v225_v21 = vsub.f32 2.0, %v221_v19 }
 0x146   : > { %253 = vrot.lane.b32.xlu1 %v232_v14, %s1408_s17  ;;  %v230_v22 = vmul.f32 %v1263_v15, %v226_v20 }
 0x147   : > { %251 = vrot.lane.b32.xlu0 %v231_v16, %s1408_s17  ;;  %v229_v24 = vmul.f32 %v1265_v17, %v225_v21 }
 0x148   : > { %v234_v26 = vmul.f32 %v230_v22, %v1542_v23 }
 0x149   : > { %v233_v27 = vmul.f32 %v229_v24, %v1547_v25 }
 0x14a   : > { %265 = vrot.lane.b32.xlu1 %v232_v14, %s1409_s18 }
 0x14b   : > { %263 = vrot.lane.b32.xlu0 %v231_v16, %s1409_s18 }
 0x14e   : > { %245 = vrot.lane.b32.xlu1 %v234_v26, %s1410_s19 }
 0x14f   : > { %243 = vrot.lane.b32.xlu0 %v233_v27, %s1410_s19 }
 0x152   : > { %257 = vrot.lane.b32.xlu1 %v234_v26, %s1408_s17 }
 0x153   : > { %255 = vrot.lane.b32.xlu0 %v233_v27, %s1408_s17 }
 0x156   : > { %269 = vrot.lane.b32.xlu1 %v234_v26, %s1409_s18 }
 0x157   : > { %267 = vrot.lane.b32.xlu0 %v233_v27, %s1409_s18 }
 0x1b4   : > { %v242_v28 = vpop.permute.xlu1 %241 }
 0x1b5   : > { %v240_v29 = vpop.permute.xlu0 %239  ;;  %v276_v32 = vsel %vm88_vm0, %v232_v14, %v242_v28 }
 0x1b6   : > { %v275_v33 = vsel %vm88_vm0, %v231_v16, %v240_v29 }
 0x1b8   : > { %v254_v30 = vpop.permute.xlu1 %253 }
 0x1b9   : > { %v252_v31 = vpop.permute.xlu0 %251  ;;  %v280_v34 = vsel %vm93_vm1, %v276_v32, %v254_v30 }
 0x1ba   : > { %v279_v36 = vsel %vm93_vm1, %v275_v33, %v252_v31 }
 0x1bc   : > { %v266_v35 = vpop.permute.xlu1 %265 }
 0x1bd   : > { %v284_v37 = vsel %vm98_vm2, %v280_v34, %v266_v35  ;;  %v264_v38 = vpop.permute.xlu0 %263 }
 0x1be   : > { %v1565_v39 = vmul.f32 %v1493_v41, %v284_v37  ;;  %v283_v44 = vsel %vm98_vm2, %v279_v36, %v264_v38 }
 0x1bf   : > { %v287_v45 = vmul.f32 %v1487_v40, %v283_v44 }
 0x1c0   : > { %313 = vrot.lane.b32.xlu1 %v1565_v39, %s1409_s18  ;;  %v246_v46 = vpop.permute.xlu1 %245  ;;  %v294_v58 = vsel %vm88_vm0, %v1565_v39, 0.0 }
 0x1c1   : > { %311 = vrot.lane.b32.xlu0 %v287_v45, %s1409_s18  ;;  %1090 = vmatprep.mubr.f32.mxu0 %v287_v45  ;;  %v244_v47 = vpop.permute.xlu0 %243  ;;  %v278_v49 = vsel %vm88_vm0, %v234_v26, %v246_v46 }
 0x1c2   : > { %v277_v50 = vsel %vm88_vm0, %v233_v27, %v244_v47 }
 0x1c4   : > { %341 = vrot.lane.b32.xlu1 %v1565_v39, %s1408_s17  ;;  %v258_v48 = vpop.permute.xlu1 %257 }
 0x1c5   : > { %339 = vrot.lane.b32.xlu0 %v287_v45, %s1408_s17  ;;  %v256_v41 = vpop.permute.xlu0 %255  ;;  %v282_v40 = vsel %vm93_vm1, %v278_v49, %v258_v48 }
 0x1c6   : > { %v281_v52 = vsel %vm93_vm1, %v277_v50, %v256_v41 }
 0x1c8   : > { %369 = vrot.lane.b32.xlu1 %v1565_v39, %s1410_s19  ;;  %v270_v51 = vpop.permute.xlu1 %269 }
 0x1c9   : > { %v286_v53 = vsel %vm98_vm2, %v282_v40, %v270_v51  ;;  %367 = vrot.lane.b32.xlu0 %v287_v45, %s1410_s19  ;;  %v268_v54 = vpop.permute.xlu0 %267  ;;  %v1622_v40 = vld [vmem:[#allocation2] sm:$0xff] }
 0x1ca   : > { %v1584_v55 = vmul.f32 %v1495_v42, %v286_v53  ;;  %v285_v56 = vsel %vm98_vm2, %v281_v52, %v268_v54  ;;  %v291_v42 = vsel %vm88_vm0, %v287_v45, 0.0  ;;  %v1628_v54 = vld [vmem:[#allocation2 + $0x8] sm:$0xff] }
 0x1cb   : > { %v289_v57 = vmul.f32 %v1501_v43, %v285_v56 }
 0x1cc   : > { %317 = vrot.lane.b32.xlu1 %v1584_v55, %s1409_s18  ;;  %v300_v43 = vsel %vm88_vm0, %v1584_v55, 0.0 }
 0x1cd   : > { %315 = vrot.lane.b32.xlu0 %v289_v57, %s1409_s18  ;;  %1093 = vmatprep.mubr.f32.mxu1 %v289_v57  ;;  %v297_v59 = vsel %vm88_vm0, %v289_v57, 0.0 }
 0x1d0   : > { %345 = vrot.lane.b32.xlu1 %v1584_v55, %s1408_s17 }
 0x1d1   : > { %343 = vrot.lane.b32.xlu0 %v289_v57, %s1408_s17 }
 0x1d4   : > { %373 = vrot.lane.b32.xlu1 %v1584_v55, %s1410_s19 }
 0x1d5   : > { %371 = vrot.lane.b32.xlu0 %v289_v57, %s1410_s19 }
 0x1f4   : > { %292 = vadd.xlane.f32.xlu0 %v291_v42 }
 0x1f8   : > { %301 = vadd.xlane.f32.xlu0 %v300_v43  ;;  %295 = vadd.xlane.f32.xlu1 %v294_v58 }
 0x1fc   : > { %298 = vadd.xlane.f32.xlu1 %v297_v59  ;;  %v1638_v59 = vld [vmem:[#allocation5] sm:$0xff] }
 0x232   : > { %v314_v60 = vpop.permute.xlu1 %313 }
 0x233   : > { %v312_v61 = vpop.permute.xlu0 %311  ;;  %v326_v1 = vsel %vm88_vm0, %v314_v60, 0.0  ;;  %v1640_v60 = vld [vmem:[#allocation5 + $0x8] sm:$0xff] }
 0x234   : > { %v323_v62 = vsel %vm88_vm0, %v312_v61, 0.0 }
 0x235   : > { %324 = vadd.xlane.f32.xlu0 %v323_v62 }
 0x236   : > { %v342_v63 = vpop.permute.xlu1 %341 }
 0x237   : > { %v340_v0 = vpop.permute.xlu0 %339  ;;  %v354_v5 = vsel %vm88_vm0, %v342_v63, 0.0 }
 0x238   : > { %v351_v2 = vsel %vm88_vm0, %v340_v0, 0.0 }
 0x239   : > { %327 = vadd.xlane.f32.xlu0 %v326_v1  ;;  %352 = vadd.xlane.f32.xlu1 %v351_v2 }
 0x23a   : > { %v370_v3 = vpop.permute.xlu1 %369 }
 0x23b   : > { %v368_v4 = vpop.permute.xlu0 %367  ;;  %v382_v10 = vsel %vm88_vm0, %v370_v3, 0.0 }
 0x23c   : > { %v379_v6 = vsel %vm88_vm0, %v368_v4, 0.0 }
 0x23d   : > { %355 = vadd.xlane.f32.xlu0 %v354_v5  ;;  %380 = vadd.xlane.f32.xlu1 %v379_v6 }
 0x23e   : > { %v318_v7 = vpop.permute.xlu1 %317 }
 0x23f   : > { %v316_v8 = vpop.permute.xlu0 %315  ;;  %v332_v15 = vsel %vm88_vm0, %v318_v7, 0.0 }
 0x240   : > { %v329_v11 = vsel %vm88_vm0, %v316_v8, 0.0 }
 0x241   : > { %383 = vadd.xlane.f32.xlu0 %v382_v10  ;;  %330 = vadd.xlane.f32.xlu1 %v329_v11  ;;  %v1652_v10 = vld [vmem:[#allocation2 + $0x10] sm:$0xff] }
 0x242   : > { %v346_v13 = vpop.permute.xlu1 %345 }
 0x243   : > { %v344_v14 = vpop.permute.xlu0 %343  ;;  %v360_v18 = vsel %vm88_vm0, %v346_v13, 0.0 }
 0x244   : > { %v357_v16 = vsel %vm88_vm0, %v344_v14, 0.0 }
 0x245   : > { %333 = vadd.xlane.f32.xlu0 %v332_v15  ;;  %358 = vadd.xlane.f32.xlu1 %v357_v16  ;;  %v1658_v15 = vld [vmem:[#allocation2 + $0x18] sm:$0xff] }
 0x246   : > { %v374_v20 = vpop.permute.xlu1 %373 }
 0x247   : > { %v372_v17 = vpop.permute.xlu0 %371  ;;  %v388_v21 = vsel %vm88_vm0, %v374_v20, 0.0  ;;  %v1666_v20 = vld [vmem:[#allocation5 + $0x10] sm:$0xff] }
 0x248   : > { %v385_v19 = vsel %vm88_vm0, %v372_v17, 0.0 }
 0x249   : > { %361 = vadd.xlane.f32.xlu0 %v360_v18  ;;  %386 = vadd.xlane.f32.xlu1 %v385_v19 }
 0x24d   : > { %389 = vadd.xlane.f32.xlu0 %v388_v21  ;;  %v1668_v21 = vld [vmem:[#allocation5 + $0x18] sm:$0xff] }
 0x281   : > { %v293_v22 = vpop.xlane.xlu0 %292 }
 0x285   : > { %v296_v24 = vpop.xlane.xlu1 %295  ;;  %v302_v26 = vpop.xlane.xlu0 %301 }
 0x289   : > { %v299_v27 = vpop.xlane.xlu1 %298 }
 0x2c2   : > { %v325_v28 = vpop.xlane.xlu0 %324 }
 0x2c3   : > { %1266 = vrsqrt.f32 %v325_v28 }
 0x2c6   : > { %v353_v29 = vpop.xlane.xlu1 %352  ;;  %v328_v30 = vpop.xlane.xlu0 %327 }
 0x2c7   : > { %1268 = vrsqrt.f32 %v353_v29 }
 0x2c8   : > { %1270 = vrsqrt.f32 %v293_v22  ;;  %v1670_v22 = vld [vmem:[#allocation5 + $0x28] sm:$0xff] }
 0x2ca   : > { %v381_v31 = vpop.xlane.xlu1 %380  ;;  %v356_v32 = vpop.xlane.xlu0 %355 }
 0x2cb   : > { %1272 = vrsqrt.f32 %v381_v31 }
 0x2cc   : > { %1274 = vrsqrt.f32 %v328_v30  ;;  %v1680_v30 = vld [vmem:[#allocation5 + $0x38] sm:$0xff] }
 0x2cd   : > { %1276 = vrsqrt.f32 %v356_v32  ;;  %v1267_v35 = vpop.eup %1266 }
 0x2ce   : > { %1278 = vrsqrt.f32 %v296_v24  ;;  %v331_v33 = vpop.xlane.xlu1 %330  ;;  %v384_v34 = vpop.xlane.xlu0 %383 }
 0x2cf   : > { %1280 = vrsqrt.f32 %v384_v34 }
 0x2d0   : > { %1282 = vrsqrt.f32 %v331_v33  ;;  %v1684_v33 = vld [vmem:[#allocation5 + $0x30] sm:$0xff] }
 0x2d1   : > { %v1269_v38 = vpop.eup %1268 }
 0x2d2   : > { %v359_v36 = vpop.xlane.xlu1 %358  ;;  %v334_v37 = vpop.xlane.xlu0 %333 }
 0x2d3   : > { %v1271_v44 = vpop.eup %1270  ;;  %1284 = vrsqrt.f32 %v359_v36  ;;  %v1687_v36 = vld [vmem:[#allocation5 + $0x48] sm:$0xff] }
 0x2d4   : > { %1286 = vrsqrt.f32 %v299_v27  ;;  %v395_v46 = vsel %vm88_vm0, %v1271_v44, %v1267_v35 }
 0x2d5   : > { %v1273_v45 = vpop.eup %1272  ;;  %v399_v48 = vsel %vm93_vm1, %v395_v46, %v1269_v38  ;;  %1288 = vrsqrt.f32 %v334_v37  ;;  %v1690_v38 = vld [vmem:[#allocation5 + $0x40] sm:$0xff]  ;;  %v1694_v46 = vld [vmem:[#allocation5 + $0x58] sm:$0xff] }
 0x2d6   : > { %v1275_v47 = vpop.eup %1274  ;;  %v387_v41 = vpop.xlane.xlu1 %386  ;;  %v1625_v51 = vsel %vm98_vm2, %v399_v48, %v1273_v45  ;;  %v1698_v48 = vld [vmem:[#allocation5 + $0x50] sm:$0xff] }
 0x2d7   : > { %v362_v49 = vpop.xlane.xlu0 %361  ;;  %v1277_v50 = vpop.eup %1276  ;;  %1290 = vrsqrt.f32 %v387_v41  ;;  %v1632_v57 = vmul.f32 %v1625_v51, %v1622_v40 }
 0x2d8   : > { %v1279_v52 = vpop.eup %1278  ;;  %1292 = vrsqrt.f32 %v362_v49 }
 0x2d9   : > { %1294 = vrsqrt.f32 %v302_v26  ;;  %v396_v53 = vsel %vm88_vm0, %v1279_v52, %v1275_v47  ;;  %v1281_v56 = vpop.eup %1280  ;;  %v411_v0 = vmul.f32 %v1632_v57, %v1638_v59  ;;  %v1674_v26 = vld [vmem:[#allocation5 + $0x20] sm:$0xff]  ;;  %v419_v47 = vmul.f32 %v1632_v57, %v1690_v38 }
 0x2da   : > { %v400_v42 = vsel %vm93_vm1, %v396_v53, %v1277_v50  ;;  %v1283_v62 = vpop.eup %1282  ;;  %v415_v32 = vmul.f32 %v1632_v57, %v1674_v26  ;;  %v1701_v50 = vld [vmem:[#allocation5 + $0x68] sm:$0xff]  ;;  %v1704_v53 = vld [vmem:[#allocation5 + $0x60] sm:$0xff] }
 0x2db   : > { %v390_v43 = vpop.xlane.xlu0 %389  ;;  %v1636_v58 = vsel %vm98_vm2, %v400_v42, %v1281_v56 }
 0x2dc   : > { %1296 = vrsqrt.f32 %v390_v43  ;;  %v1644_v61 = vmul.f32 %v1636_v58, %v1628_v54  ;;  %v1708_v43 = vld [vmem:[#allocation5 + $0x78] sm:$0xff] }
 0x2dd   : > { %v1285_v63 = vpop.eup %1284 }
 0x2de   : > { %v412_v1 = vmul.f32 %v1644_v61, %v1640_v60  ;;  %v1287_v2 = vpop.eup %1286  ;;  %v416_v29 = vmul.f32 %v1644_v61, %v1670_v22  ;;  %v420_v45 = vmul.f32 %v1644_v61, %v1687_v36  ;;  %v424_v42 = vmul.f32 %v1644_v61, %v1701_v50 }
 0x2df   : > { %v1289_v3 = vpop.eup %1288  ;;  %v397_v4 = vsel %vm88_vm0, %v1287_v2, %v1283_v62  ;;  %v423_v62 = vmul.f32 %v1632_v57, %v1704_v53 }
 0x2e0   : > { %v1134_v5 = vpack.c.bf16 %v412_v1, %v411_v0  ;;  %v401_v7 = vsel %vm93_vm1, %v397_v4, %v1285_v63  ;;  %v1142_v34 = vpack.c.bf16 %v416_v29, %v415_v32  ;;  %v1150_v41 = vpack.c.bf16 %v420_v45, %v419_v47  ;;  %v1712_v63 = vld [vmem:[#allocation5 + $0x70] sm:$0xff] }
 0x2e1   : > { %v1291_v6 = vpop.eup %1290  ;;  %v1158_v0 = vpack.c.bf16 %v424_v42, %v423_v62 }
 0x2e2   : > { %v1293_v8 = vpop.eup %1292  ;;  %v1655_v11 = vsel %vm98_vm2, %v401_v7, %v1291_v6  ;;  %1135 = vmatprep.subr.bf16.mxu0 %v1134_v5  ;;  %1198 = vmatprep.subr.bf16.mxu1 %v1134_v5 }
 0x2e3   : > { %v1295_v13 = vpop.eup %1294  ;;  %1137 = vmatpush3.bf16.msra.mxu0 %v1134_v5  ;;  %1206 = vmatpush3.bf16.msra.mxu1 %v1134_v5  ;;  %v409_v17 = vmul.f32 %v1655_v11, %v1652_v10 }
 0x2e4   : > { %v398_v14 = vsel %vm88_vm0, %v1295_v13, %v1289_v3 }
 0x2e5   : > { %v402_v18 = vsel %vm93_vm1, %v398_v14, %v1293_v8  ;;  %v413_v27 = vmul.f32 %v409_v17, %v1666_v20  ;;  %v417_v37 = vmul.f32 %v409_v17, %v1684_v33  ;;  %v421_v52 = vmul.f32 %v409_v17, %v1698_v48 }
 0x2e6   : > { %v1297_v16 = vpop.eup %1296  ;;  %v425_v61 = vmul.f32 %v409_v17, %v1712_v63 }
 0x2e7   : > { %v1664_v19 = vsel %vm98_vm2, %v402_v18, %v1297_v16  ;;  %v526_v16 = vld [vmem:[#allocation3 + $0x18] sm:$0xff] (!%p1016_p10) }
 0x2e8   : > { %v410_v24 = vmul.f32 %v1664_v19, %v1658_v15 }
 0x2ea   : > { %v414_v28 = vmul.f32 %v410_v24, %v1668_v21  ;;  %v418_v35 = vmul.f32 %v410_v24, %v1680_v30  ;;  %v422_v49 = vmul.f32 %v410_v24, %v1694_v46  ;;  %v426_v1 = vmul.f32 %v410_v24, %v1708_v43 }
 0x2ec   : > { %v1138_v31 = vpack.c.bf16 %v414_v28, %v413_v27  ;;  %v1146_v44 = vpack.c.bf16 %v418_v35, %v417_v37  ;;  %v1154_v56 = vpack.c.bf16 %v422_v49, %v421_v52  ;;  %v1162_v2 = vpack.c.bf16 %v426_v1, %v425_v61 }
 0x2ee   : > { %1139 = vmatprep.subr.bf16.mxu0 %v1138_v31  ;;  %1199 = vmatprep.subr.bf16.mxu1 %v1138_v31 }
 0x2ef   : > { %1141 = vmatpush3.bf16.msra.mxu0 %v1138_v31  ;;  %1207 = vmatpush3.bf16.msra.mxu1 %v1138_v31 }
 0x2f0   : > { %1143 = vmatprep.subr.bf16.mxu0 %v1142_v34  ;;  %1200 = vmatprep.subr.bf16.mxu1 %v1142_v34 }
 0x2f3   : > { %1145 = vmatpush3.bf16.msra.mxu0 %v1142_v34  ;;  %1208 = vmatpush3.bf16.msra.mxu1 %v1142_v34 }
 0x2f4   : > { %1147 = vmatprep.subr.bf16.mxu0 %v1146_v44  ;;  %1201 = vmatprep.subr.bf16.mxu1 %v1146_v44 }
 0x2f7   : > { %1149 = vmatpush3.bf16.msra.mxu0 %v1146_v44  ;;  %1209 = vmatpush3.bf16.msra.mxu1 %v1146_v44 }
 0x2f8   : > { %1151 = vmatprep.subr.bf16.mxu0 %v1150_v41  ;;  %1202 = vmatprep.subr.bf16.mxu1 %v1150_v41 }
 0x2fb   : > { %1153 = vmatpush3.bf16.msra.mxu0 %v1150_v41  ;;  %1210 = vmatpush3.bf16.msra.mxu1 %v1150_v41 }
 0x2fc   : > { %1155 = vmatprep.subr.bf16.mxu0 %v1154_v56  ;;  %1203 = vmatprep.subr.bf16.mxu1 %v1154_v56 }
 0x2ff   : > { %1157 = vmatpush3.bf16.msra.mxu0 %v1154_v56  ;;  %1211 = vmatpush3.bf16.msra.mxu1 %v1154_v56 }
 0x300   : > { %1159 = vmatprep.subr.bf16.mxu0 %v1158_v0  ;;  %1204 = vmatprep.subr.bf16.mxu1 %v1158_v0 }
 0x303   : > { %1161 = vmatpush3.bf16.msra.mxu0 %v1158_v0  ;;  %1212 = vmatpush3.bf16.msra.mxu1 %v1158_v0 }
 0x304   : > { %1163 = vmatprep.subr.bf16.mxu0 %v1162_v2  ;;  %1205 = vmatprep.subr.bf16.mxu1 %v1162_v2 }
 0x307   : > { %1165 = vmatpush3.bf16.msra.mxu0 %v1162_v2  ;;  %1213 = vmatpush3.bf16.msra.mxu1 %v1162_v2 }
 0x30a   : > { %1091 = vmatmul.mubr.f32.vlgmr.msra.gmra.mrb[0].mxu0 %v1565_v39  ;;  %1094 = vmatmul.mubr.f32.vlgmr.msra.gmra.mrb[0].mxu1 %v1584_v55  ;;  %v523_v39 = vld [vmem:[#allocation3] sm:$0xff] (!%p1016_p10)  ;;  %v524_v55 = vld [vmem:[#allocation3 + $0x8] sm:$0xff] (!%p1016_p10) }
 0x3d9   : > { %518 = sbr.rel (%p1016_p10) target bundleno = 996 (0x3e4), region = 28 }
 0x3dd   : > { %v1092_v57 = vpop.f32.mrb[0].mxu0  ;;  %v1095_v3 = vpop.f32.mrb[0].mxu1 }
 0x3de   : > { %v1719_v4 = vmul.f32 %v1092_v57, %v1636_v58  ;;  %v1722_v5 = vmul.f32 %v1095_v3, %v1664_v19  ;;  %v493_v6 = vpop.f32.mrb[1].mxu0  ;;  %v503_v7 = vpop.f32.mrb[1].mxu1  ;;  %v525_v58 = vld [vmem:[#allocation3 + $0x10] sm:$0xff] (!%p1016_p10) }
 0x3df   : > { %v1725_v8 = vmul.f32 %v493_v6, %v1625_v51  ;;  %v1728_v13 = vmul.f32 %v503_v7, %v1655_v11 }
 0x3e0   : > { %520 = vst [vmem:[#allocation2 + $0x8] sm:$0xff] %v1719_v4  ;;  %522 = vst [vmem:[#allocation2 + $0x18] sm:$0xff] %v1722_v5  ;;  %v528_v14 = vadd.f32 %v524_v55, %v1719_v4  ;;  %v530_v17 = vadd.f32 %v526_v16, %v1722_v5 }
 0x3e1   : > { %519 = vst [vmem:[#allocation2] sm:$0xff] %v1725_v8  ;;  %521 = vst [vmem:[#allocation2 + $0x10] sm:$0xff] %v1728_v13  ;;  %v527_v51 = vadd.f32 %v523_v39, %v1725_v8  ;;  %v529_v11 = vadd.f32 %v525_v58, %v1728_v13 }
 0x3e2   : > { %532 = vst [vmem:[#allocation3 + $0x8] sm:$0xff] %v528_v14  ;;  %534 = vst [vmem:[#allocation3 + $0x18] sm:$0xff] %v530_v17 }
 0x3e3   : > { %531 = vst [vmem:[#allocation3] sm:$0xff] %v527_v51  ;;  %533 = vst [vmem:[#allocation3 + $0x10] sm:$0xff] %v529_v11 }
 0x3e4 PF: > { %p1017_p11 = scmp.ge.s32.totalorder %s1400_s16, 3 }
 0x3e5   : > { %v562_v18 = vmul.f32 (!%p1017_p11), %v1622_v40, %v1622_v40  ;;  %s1411_s6 = smov (!%p1017_p11), 64   ;;  %s1412_s1 = smov (!%p1017_p11), 96   ;;  %v563_v19 = vmul.f32 (!%p1017_p11), %v1628_v54, %v1628_v54  ;;  %v565_v24 = vmul.f32 (!%p1017_p11), %v1658_v15, %v1658_v15  ;;  %v564_v27 = vmul.f32 (!%p1017_p11), %v1652_v10, %v1652_v10 }
 0x3e6   : > { %537 = sbr.rel (%p1017_p11) target bundleno = 1671 (0x687), region = 32  ;;  %s1413_s7 = smov (!%p1017_p11), 32   ;;  %v540_v34 = vmul.f32 (!%p1017_p11), %v1728_v13, %v1728_v13  ;;  %v538_v35 = vmul.f32 (!%p1017_p11), %v1725_v8, %v1725_v8  ;;  %v539_v37 = vmul.f32 (!%p1017_p11), %v1719_v4, %v1719_v4  ;;  %v1776_v44 = vmul.f32 (!%p1017_p11), %v1722_v5, %v1722_v5 }
 0x3e7   : > { %690 = vrot.lane.b32.xlu1 (!%p1017_p11), %v562_v18, %s1411_s6  ;;  %626 = vrot.lane.b32.xlu0 (!%p1017_p11), %v562_v18, %s1412_s1  ;;  %v566_v28 = vsel (!%p1017_p11), %vm88_vm0, %v562_v18, 0.0  ;;  %v575_v29 = vsel (!%p1017_p11), %vm88_vm0, %v565_v24, 0.0  ;;  %v569_v31 = vsel (!%p1017_p11), %vm88_vm0, %v563_v19, 0.0  ;;  %v572_v32 = vsel (!%p1017_p11), %vm88_vm0, %v564_v27, 0.0 }
 0x3eb   : > { %692 = vrot.lane.b32.xlu1 (!%p1017_p11), %v563_v19, %s1411_s6  ;;  %628 = vrot.lane.b32.xlu0 (!%p1017_p11), %v563_v19, %s1412_s1 }
 0x3ef   : > { %756 = vrot.lane.b32.xlu1 %v563_v19, %s1413_s7  ;;  %754 = vrot.lane.b32.xlu0 %v562_v18, %s1413_s7  ;;  %v542_v19 = vsel %vm88_vm0, %v538_v35, 0.0 }
 0x3f3   : > { %632 = vrot.lane.b32.xlu1 %v565_v24, %s1412_s1  ;;  %630 = vrot.lane.b32.xlu0 %v564_v27, %s1412_s1 }
 0x3f7   : > { %696 = vrot.lane.b32.xlu1 %v565_v24, %s1411_s6  ;;  %694 = vrot.lane.b32.xlu0 %v564_v27, %s1411_s6 }
 0x3fb   : > { %760 = vrot.lane.b32.xlu1 %v565_v24, %s1413_s7  ;;  %758 = vrot.lane.b32.xlu0 %v564_v27, %s1413_s7 }
 0x41a   : > { %567 = vadd.xlane.f32.xlu0 %v566_v28  ;;  %v548_v28 = vsel %vm88_vm0, %v540_v34, 0.0 }
 0x41e   : > { %576 = vadd.xlane.f32.xlu0 %v575_v29 }
 0x41f   : > { %570 = vadd.xlane.f32.xlu1 %v569_v31 }
 0x423   : > { %573 = vadd.xlane.f32.xlu1 %v572_v32  ;;  %v545_v32 = vsel %vm88_vm0, %v539_v37, 0.0 }
 0x434   : > { %594 = vrot.lane.b32.xlu0 %v540_v34, %s1412_s1  ;;  %590 = vrot.lane.b32.xlu1 %v538_v35, %s1412_s1 }
 0x438   : > { %658 = vrot.lane.b32.xlu0 %v538_v35, %s1411_s6  ;;  %592 = vrot.lane.b32.xlu1 %v539_v37, %s1412_s1 }
 0x43c   : > { %660 = vrot.lane.b32.xlu0 %v539_v37, %s1411_s6  ;;  %596 = vrot.lane.b32.xlu1 %v1776_v44, %s1412_s1 }
 0x440   : > { %722 = vrot.lane.b32.xlu0 %v538_v35, %s1413_s7  ;;  %662 = vrot.lane.b32.xlu1 %v540_v34, %s1411_s6 }
 0x444   : > { %664 = vrot.lane.b32.xlu1 %v1776_v44, %s1411_s6 }
 0x448   : > { %726 = vrot.lane.b32.xlu1 %v540_v34, %s1413_s7  ;;  %v551_v34 = vsel %vm88_vm0, %v1776_v44, 0.0 }
 0x459   : > { %v691_v45 = vpop.permute.xlu1 %690  ;;  %v627_v47 = vpop.permute.xlu0 %626 }
 0x45a   : > { %v638_v41 = vsel %vm88_vm0, %v627_v47, 0.0  ;;  %v702_v2 = vsel %vm88_vm0, %v691_v45, 0.0 }
 0x45d   : > { %v693_v49 = vpop.permute.xlu1 %692  ;;  %v629_v52 = vpop.permute.xlu0 %628 }
 0x45e   : > { %v641_v56 = vsel %vm88_vm0, %v629_v52, 0.0  ;;  %v705_v0 = vsel %vm88_vm0, %v693_v49, 0.0 }
 0x45f   : > { %639 = vadd.xlane.f32.xlu0 %v638_v41 }
 0x461   : > { %v757_v42 = vpop.permute.xlu1 %756  ;;  %v755_v62 = vpop.permute.xlu0 %754 }
 0x462   : > { %v769_v61 = vsel %vm88_vm0, %v757_v42, 0.0  ;;  %v766_v7 = vsel %vm88_vm0, %v755_v62, 0.0 }
 0x463   : > { %642 = vadd.xlane.f32.xlu0 %v641_v56 }
 0x465   : > { %v633_v1 = vpop.permute.xlu1 %632  ;;  %v631_v57 = vpop.permute.xlu0 %630 }
 0x466   : > { %v647_v6 = vsel %vm88_vm0, %v633_v1, 0.0  ;;  %v644_v51 = vsel %vm88_vm0, %v631_v57, 0.0 }
 0x467   : > { %706 = vadd.xlane.f32.xlu0 %v705_v0 }
 0x469   : > { %v697_v3 = vpop.permute.xlu1 %696  ;;  %v695_v39 = vpop.permute.xlu0 %694 }
 0x46a   : > { %v711_v55 = vsel %vm88_vm0, %v697_v3, 0.0  ;;  %v708_v11 = vsel %vm88_vm0, %v695_v39, 0.0 }
 0x46b   : > { %770 = vadd.xlane.f32.xlu0 %v769_v61 }
 0x46c   : > { %703 = vadd.xlane.f32.xlu1 %v702_v2 }
 0x46d   : > { %v761_v58 = vpop.permute.xlu1 %760  ;;  %v759_v16 = vpop.permute.xlu0 %758 }
 0x46e   : > { %v775_v14 = vsel %vm88_vm0, %v761_v58, 0.0  ;;  %v772_v17 = vsel %vm88_vm0, %v759_v16, 0.0 }
 0x46f   : > { %648 = vadd.xlane.f32.xlu0 %v647_v6 }
 0x470   : > { %767 = vadd.xlane.f32.xlu1 %v766_v7 }
 0x473   : > { %712 = vadd.xlane.f32.xlu0 %v711_v55 }
 0x474   : > { %645 = vadd.xlane.f32.xlu1 %v644_v51 }
 0x477   : > { %776 = vadd.xlane.f32.xlu0 %v775_v14 }
 0x478   : > { %709 = vadd.xlane.f32.xlu1 %v708_v11 }
 0x47c   : > { %773 = vadd.xlane.f32.xlu1 %v772_v17 }
 0x48d   : > { %728 = vrot.lane.b32.xlu1 %v1776_v44, %s1413_s7  ;;  %724 = vrot.lane.b32.xlu0 %v539_v37, %s1413_s7 }
 0x4a7   : > { %v568_v18 = vpop.xlane.xlu0 %567 }
 0x4ab   : > { %v1802_v24 = vpop.xlane.xlu0 %576 }
 0x4ac   : > { %v571_v27 = vpop.xlane.xlu1 %570  ;;  %543 = vadd.xlane.f32.xlu0 %v542_v19 }
 0x4ad   : > { %v579_v14 = vmax.f32 %v571_v27, 1e-24 }
 0x4af   : > { %v595_v29 = vpop.permute.xlu0 %594 }
 0x4b0   : > { %v1805_v31 = vpop.xlane.xlu1 %573  ;;  %v608_v52 = vsel %vm88_vm0, %v595_v29, 0.0  ;;  %v578_v29 = vmax.f32 %v568_v18, 1e-24 }
 0x4b1   : > { %549 = vadd.xlane.f32.xlu1 %v548_v28 }
 0x4b3   : > { %v659_v41 = vpop.permute.xlu0 %658 }
 0x4b4   : > { %v591_v45 = vpop.permute.xlu1 %590  ;;  %v670_v37 = vsel %vm88_vm0, %v659_v41, 0.0 }
 0x4b5   : > { %546 = vadd.xlane.f32.xlu1 %v545_v32  ;;  %v602_v47 = vsel %vm88_vm0, %v591_v45, 0.0 }
 0x4b6   : > { %603 = vadd.xlane.f32.xlu0 %v602_v47 }
 0x4b7   : > { %v661_v56 = vpop.permute.xlu0 %660 }
 0x4b8   : > { %v593_v49 = vpop.permute.xlu1 %592  ;;  %v673_v0 = vsel %vm88_vm0, %v661_v56, 0.0 }
 0x4b9   : > { %v605_v35 = vsel %vm88_vm0, %v593_v49, 0.0 }
 0x4ba   : > { %606 = vadd.xlane.f32.xlu1 %v605_v35  ;;  %609 = vadd.xlane.f32.xlu0 %v608_v52  ;;  %v581_v52 = vmax.f32 %v1802_v24, 1e-24 }
 0x4bb   : > { %v723_v61 = vpop.permute.xlu0 %722 }
 0x4bc   : > { %v597_v42 = vpop.permute.xlu1 %596  ;;  %v734_v57 = vsel %vm88_vm0, %v723_v61, 0.0 }
 0x4bd   : > { %v611_v1 = vsel %vm88_vm0, %v597_v42, 0.0 }
 0x4be   : > { %671 = vadd.xlane.f32.xlu1 %v670_v37  ;;  %552 = vadd.xlane.f32.xlu0 %v551_v34  ;;  %v580_v37 = vmax.f32 %v1805_v31, 1e-24 }
 0x4c0   : > { %v663_v62 = vpop.permute.xlu1 %662 }
 0x4c1   : > { %v676_v3 = vsel %vm88_vm0, %v663_v62, 0.0 }
 0x4c2   : > { %674 = vadd.xlane.f32.xlu1 %v673_v0  ;;  %612 = vadd.xlane.f32.xlu0 %v611_v1 }
 0x4c4   : > { %v665_v2 = vpop.permute.xlu1 %664 }
 0x4c5   : > { %v679_v44 = vsel %vm88_vm0, %v665_v2, 0.0 }
 0x4c6   : > { %735 = vadd.xlane.f32.xlu1 %v734_v57  ;;  %677 = vadd.xlane.f32.xlu0 %v676_v3 }
 0x4c8   : > { %v727_v6 = vpop.permute.xlu1 %726 }
 0x4c9   : > { %v740_v7 = vsel %vm88_vm0, %v727_v6, 0.0 }
 0x4ca   : > { %680 = vadd.xlane.f32.xlu0 %v679_v44 }
 0x4ce   : > { %741 = vadd.xlane.f32.xlu0 %v740_v7 }
 0x4ec   : > { %v640_v39 = vpop.xlane.xlu0 %639 }
 0x4ed   : > { %v650_v16 = vmax.f32 %v640_v39, 1e-24 }
 0x4f0   : > { %v643_v55 = vpop.xlane.xlu0 %642 }
 0x4f1   : > { %v651_v58 = vmax.f32 %v643_v55, 1e-24 }
 0x4f3   : > { %1298 = vrsqrt.f32 %v651_v58 }
 0x4f4   : > { %v707_v51 = vpop.xlane.xlu0 %706 }
 0x4f5   : > { %v715_v11 = vmax.f32 %v707_v51, 1e-24 }
 0x4f7   : > { %1300 = vrsqrt.f32 %v715_v11 }
 0x4f8   : > { %v771_v17 = vpop.xlane.xlu0 %770  ;;  %1302 = vrsqrt.f32 %v579_v14 }
 0x4f9   : > { %v779_v19 = vmax.f32 %v771_v17, 1e-24  ;;  %v704_v28 = vpop.xlane.xlu1 %703 }
 0x4fa   : > { %v714_v32 = vmax.f32 %v704_v28, 1e-24 }
 0x4fb   : > { %1304 = vrsqrt.f32 %v779_v19 }
 0x4fc   : > { %1306 = vrsqrt.f32 %v650_v16  ;;  %v649_v45 = vpop.xlane.xlu0 %648 }
 0x4fd   : > { %1308 = vrsqrt.f32 %v714_v32  ;;  %v768_v47 = vpop.xlane.xlu1 %767  ;;  %v653_v49 = vmax.f32 %v649_v45, 1e-24  ;;  %v1299_v35 = vpop.eup %1298 }
 0x4fe   : > { %1310 = vrsqrt.f32 %v578_v29  ;;  %v778_v41 = vmax.f32 %v768_v47, 1e-24 }
 0x500   : > { %1312 = vrsqrt.f32 %v778_v41  ;;  %v713_v27 = vpop.xlane.xlu0 %712 }
 0x501   : > { %v717_v34 = vmax.f32 %v713_v27, 1e-24  ;;  %v646_v56 = vpop.xlane.xlu1 %645  ;;  %v1301_v42 = vpop.eup %1300  ;;  %1314 = vrsqrt.f32 %v653_v49 }
 0x502   : > { %v1303_v18 = vpop.eup %1302  ;;  %v652_v0 = vmax.f32 %v646_v56, 1e-24 }
 0x503   : > { %v803_v62 = vsel %vm88_vm0, %v1303_v18, %v1299_v35  ;;  %1316 = vrsqrt.f32 %v717_v34 }
 0x504   : > { %v777_v1 = vpop.xlane.xlu0 %776  ;;  %1318 = vrsqrt.f32 %v581_v52  ;;  %v807_v2 = vsel %vm93_vm1, %v803_v62, %v1301_v42 }
 0x505   : > { %v1305_v61 = vpop.eup %1304  ;;  %v781_v57 = vmax.f32 %v777_v1, 1e-24  ;;  %v710_v3 = vpop.xlane.xlu1 %709  ;;  %1320 = vrsqrt.f32 %v580_v37 }
 0x506   : > { %v1307_v44 = vpop.eup %1306  ;;  %v811_v24 = vsel %vm98_vm2, %v807_v2, %v1305_v61  ;;  %v716_v6 = vmax.f32 %v710_v3, 1e-24 }
 0x507   : > { %v1309_v7 = vpop.eup %1308  ;;  %v815_v31 = vmul.f32 %v811_v24, %v1628_v54  ;;  %1322 = vrsqrt.f32 %v781_v57 }
 0x508   : > { %v1311_v39 = vpop.eup %1310  ;;  %1324 = vrsqrt.f32 %v652_v0  ;;  %v725_v55 = vpop.permute.xlu0 %724 }
 0x509   : > { %v802_v58 = vsel %vm88_vm0, %v1311_v39, %v1307_v44  ;;  %1326 = vrsqrt.f32 %v716_v6  ;;  %v774_v51 = vpop.xlane.xlu1 %773  ;;  %v737_v14 = vsel %vm88_vm0, %v725_v55, 0.0 }
 0x50a   : > { %v1313_v11 = vpop.eup %1312  ;;  %1328 = vtanh.f32 %v815_v31  ;;  %v806_v16 = vsel %vm93_vm1, %v802_v58, %v1309_v7  ;;  %v780_v17 = vmax.f32 %v774_v51, 1e-24  ;;  %738 = vadd.xlane.f32.xlu1 %v737_v14 }
 0x50b   : > { %v810_v19 = vsel %vm98_vm2, %v806_v16, %v1313_v11  ;;  %v1315_v28 = vpop.eup %1314 }
 0x50c   : > { %v814_v54 = vmul.f32 %v810_v19, %v1622_v40  ;;  %1330 = vrsqrt.f32 %v780_v17 }
 0x50d   : > { %v729_v29 = vpop.permute.xlu1 %728  ;;  %v1317_v32 = vpop.eup %1316 }
 0x50e   : > { %1332 = vtanh.f32 %v814_v54  ;;  %v743_v45 = vsel %vm88_vm0, %v729_v29, 0.0  ;;  %v1319_v47 = vpop.eup %1318 }
 0x50f   : > { %744 = vadd.xlane.f32.xlu0 %v743_v45  ;;  %v1321_v41 = vpop.eup %1320  ;;  %v805_v49 = vsel %vm88_vm0, %v1319_v47, %v1315_v28 }
 0x510   : > { %v809_v35 = vsel %vm93_vm1, %v805_v49, %v1317_v32 }
 0x511   : > { %v1323_v27 = vpop.eup %1322 }
 0x512   : > { %v1325_v52 = vpop.eup %1324  ;;  %v813_v34 = vsel %vm98_vm2, %v809_v35, %v1323_v27 }
 0x513   : > { %v1327_v56 = vpop.eup %1326  ;;  %v817_v40 = vmul.f32 %v813_v34, %v1658_v15  ;;  %v804_v37 = vsel %vm88_vm0, %v1321_v41, %v1325_v52 }
 0x514   : > { %v1329_v42 = vpop.eup %1328  ;;  %v808_v62 = vsel %vm93_vm1, %v804_v37, %v1327_v56 }
 0x515   : > { %1334 = vtanh.f32 %v817_v40  ;;  %v823_v1 = vmul.f32 %v1329_v42, %v1640_v60  ;;  %v827_v57 = vmul.f32 %v1329_v42, %v1670_v22  ;;  %v831_v3 = vmul.f32 %v1329_v42, %v1687_v36 }
 0x516   : > { %v1331_v18 = vpop.eup %1330  ;;  %v835_v15 = vmul.f32 %v1329_v42, %v1701_v50 }
 0x517   : > { %v812_v0 = vsel %vm98_vm2, %v808_v62, %v1331_v18 }
 0x518   : > { %v1333_v61 = vpop.eup %1332  ;;  %v816_v2 = vmul.f32 %v812_v0, %v1652_v10 }
 0x519   : > { %v822_v44 = vmul.f32 %v1333_v61, %v1638_v59  ;;  %v826_v24 = vmul.f32 %v1333_v61, %v1674_v26  ;;  %v830_v6 = vmul.f32 %v1333_v61, %v1690_v38  ;;  %v834_v7 = vmul.f32 %v1333_v61, %v1704_v53 }
 0x51a   : > { %1336 = vtanh.f32 %v816_v2 }
 0x51b   : > { %v1166_v31 = vpack.c.bf16 %v823_v1, %v822_v44  ;;  %v1174_v60 = vpack.c.bf16 %v827_v57, %v826_v24  ;;  %v1182_v39 = vpack.c.bf16 %v831_v3, %v830_v6  ;;  %v1848_v55 = vpack.c.bf16 %v835_v15, %v834_v7  ;;  %931 = vrot.lane.b32.xlu1 %v1531_v12, %s1413_s7 }
 0x51d   : > { %1167 = vmatprep.subr.bf16.mxu0 %v1166_v31  ;;  %1214 = vmatprep.subr.bf16.mxu1 %v1166_v31 }
 0x51e   : > { %1169 = vmatpush3.bf16.xpose.msra.mxu0 %v1166_v31  ;;  %1222 = vmatpush3.bf16.xpose.msra.mxu1 %v1166_v31 }
 0x51f   : > { %935 = vrot.lane.b32.xlu1 %v1547_v25, %s1413_s7  ;;  %v1335_v59 = vpop.eup %1334 }
 0x520   : > { %v825_v22 = vmul.f32 %v1335_v59, %v1668_v21  ;;  %v829_v26 = vmul.f32 %v1335_v59, %v1680_v30  ;;  %v833_v36 = vmul.f32 %v1335_v59, %v1694_v46  ;;  %v837_v38 = vmul.f32 %v1335_v59, %v1708_v43 }
 0x523   : > { %937 = vrot.lane.b32.xlu1 %v1542_v23, %s1413_s7 }
 0x524   : > { %v1337_v10 = vpop.eup %1336 }
 0x525   : > { %v824_v50 = vmul.f32 %v1337_v10, %v1666_v20  ;;  %v828_v53 = vmul.f32 %v1337_v10, %v1684_v33  ;;  %v832_v58 = vmul.f32 %v1337_v10, %v1698_v48  ;;  %v836_v51 = vmul.f32 %v1337_v10, %v1712_v63  ;;  %933 = vrot.lane.b32.xlu0 %v1526_v9, %s1413_s7 }
 0x527   : > { %v1170_v14 = vpack.c.bf16 %v825_v22, %v824_v50  ;;  %v1178_v11 = vpack.c.bf16 %v829_v26, %v828_v53  ;;  %v1186_v21 = vpack.c.bf16 %v833_v36, %v832_v58  ;;  %v1866_v16 = vpack.c.bf16 %v837_v38, %v836_v51  ;;  %945 = vrot.lane.b32.xlu1 %v1526_v9, %s1411_s6 }
 0x529   : > { %1171 = vmatprep.subr.bf16.mxu0 %v1170_v14  ;;  %1215 = vmatprep.subr.bf16.mxu1 %v1170_v14 }
 0x52a   : > { %1173 = vmatpush3.bf16.xpose.msra.mxu0 %v1170_v14  ;;  %1223 = vmatpush3.bf16.xpose.msra.mxu1 %v1170_v14 }
 0x52b   : > { %1175 = vmatprep.subr.bf16.mxu0 %v1174_v60  ;;  %1216 = vmatprep.subr.bf16.mxu1 %v1174_v60 }
 0x52c   : > { %943 = vrot.lane.b32.xlu0 %v1531_v12, %s1411_s6  ;;  %949 = vrot.lane.b32.xlu1 %v1542_v23, %s1411_s6 }
 0x530   : > { %947 = vrot.lane.b32.xlu0 %v1547_v25, %s1411_s6  ;;  %957 = vrot.lane.b32.xlu1 %v1526_v9, %s1412_s1 }
 0x532   : > { %1177 = vmatpush3.bf16.xpose.msra.mxu0 %v1174_v60  ;;  %1224 = vmatpush3.bf16.xpose.msra.mxu1 %v1174_v60 }
 0x533   : > { %1179 = vmatprep.subr.bf16.mxu0 %v1178_v11  ;;  %1217 = vmatprep.subr.bf16.mxu1 %v1178_v11 }
 0x534   : > { %955 = vrot.lane.b32.xlu0 %v1531_v12, %s1412_s1  ;;  %961 = vrot.lane.b32.xlu1 %v1542_v23, %s1412_s1 }
 0x538   : > { %959 = vrot.lane.b32.xlu0 %v1547_v25, %s1412_s1 }
 0x539   : > { %v544_v20 = vpop.xlane.xlu0 %543 }
 0x53a   : > { %1181 = vmatpush3.bf16.xpose.msra.mxu0 %v1178_v11  ;;  %1225 = vmatpush3.bf16.xpose.msra.mxu1 %v1178_v11  ;;  %v554_v19 = vmax.f32 %v544_v20, 1e-24 }
 0x53b   : > { %1183 = vmatprep.subr.bf16.mxu0 %v1182_v39  ;;  %1218 = vmatprep.subr.bf16.mxu1 %v1182_v39 }
 0x53e   : > { %v550_v30 = vpop.xlane.xlu1 %549 }
 0x53f   : > { %v556_v40 = vmax.f32 %v550_v30, 1e-24 }
 0x542   : > { %1185 = vmatpush3.bf16.xpose.msra.mxu0 %v1182_v39  ;;  %1226 = vmatpush3.bf16.xpose.msra.mxu1 %v1182_v39  ;;  %v547_v33 = vpop.xlane.xlu1 %546 }
 0x543   : > { %1187 = vmatprep.subr.bf16.mxu0 %v1186_v21  ;;  %1219 = vmatprep.subr.bf16.mxu1 %v1186_v21  ;;  %v604_v46 = vpop.xlane.xlu0 %603  ;;  %v555_v48 = vmax.f32 %v547_v33, 1e-24 }
 0x544   : > { %v614_v54 = vmax.f32 %v604_v46, 1e-24 }
 0x545   : > { %1338 = vrsqrt.f32 %v555_v48 }
 0x547   : > { %v607_v43 = vpop.xlane.xlu1 %606  ;;  %v610_v63 = vpop.xlane.xlu0 %609 }
 0x548   : > { %v615_v17 = vmax.f32 %v607_v43, 1e-24  ;;  %v616_v37 = vmax.f32 %v610_v63, 1e-24 }
 0x54a   : > { %1340 = vrsqrt.f32 %v615_v17  ;;  %1189 = vmatpush3.bf16.xpose.msra.mxu0 %v1186_v21  ;;  %1227 = vmatpush3.bf16.xpose.msra.mxu1 %v1186_v21 }
 0x54b   : > { %1191 = vmatprep.subr.bf16.mxu0 %v1848_v55  ;;  %1220 = vmatprep.subr.bf16.mxu1 %v1848_v55  ;;  %v672_v28 = vpop.xlane.xlu1 %671  ;;  %v553_v29 = vpop.xlane.xlu0 %552  ;;  %1342 = vrsqrt.f32 %v554_v19 }
 0x54c   : > { %v682_v32 = vmax.f32 %v672_v28, 1e-24  ;;  %v557_v45 = vmax.f32 %v553_v29, 1e-24  ;;  %1344 = vrsqrt.f32 %v614_v54 }
 0x54e   : > { %1346 = vrsqrt.f32 %v682_v32 }
 0x54f   : > { %v675_v47 = vpop.xlane.xlu1 %674  ;;  %v613_v41 = vpop.xlane.xlu0 %612  ;;  %1348 = vrsqrt.f32 %v557_v45 }
 0x550   : > { %v683_v49 = vmax.f32 %v675_v47, 1e-24  ;;  %v617_v27 = vmax.f32 %v613_v41, 1e-24  ;;  %v1339_v35 = vpop.eup %1338 }
 0x552   : > { %1350 = vrsqrt.f32 %v683_v49  ;;  %1193 = vmatpush3.bf16.xpose.msra.mxu0 %v1848_v55  ;;  %1228 = vmatpush3.bf16.xpose.msra.mxu1 %v1848_v55 }
 0x553   : > { %1352 = vrsqrt.f32 %v617_v27  ;;  %1195 = vmatprep.subr.bf16.mxu0 %v1866_v16  ;;  %1221 = vmatprep.subr.bf16.mxu1 %v1866_v16  ;;  %v736_v52 = vpop.xlane.xlu1 %735  ;;  %v678_v34 = vpop.xlane.xlu0 %677 }
 0x554   : > { %v1341_v56 = vpop.eup %1340  ;;  %v746_v42 = vmax.f32 %v736_v52, 1e-24  ;;  %v684_v62 = vmax.f32 %v678_v34, 1e-24 }
 0x555   : > { %v787_v18 = vsel %vm88_vm0, %v1339_v35, %v1341_v56  ;;  %v1343_v1 = vpop.eup %1342 }
 0x556   : > { %1354 = vrsqrt.f32 %v746_v42  ;;  %v1345_v2 = vpop.eup %1344 }
 0x557   : > { %v681_v0 = vpop.xlane.xlu0 %680  ;;  %1356 = vrsqrt.f32 %v556_v40  ;;  %v786_v60 = vsel %vm88_vm0, %v1343_v1, %v1345_v2  ;;  %v924_v40 = vld [vmem:[#allocation4 + $0x8] sm:$0xff] }
 0x558   : > { %v685_v61 = vmax.f32 %v681_v0, 1e-24  ;;  %1358 = vrsqrt.f32 %v616_v37  ;;  %v1347_v57 = vpop.eup %1346  ;;  %v923_v37 = vld [vmem:[#allocation4] sm:$0xff] }
 0x559   : > { %v1349_v3 = vpop.eup %1348  ;;  %v790_v55 = vsel %vm93_vm1, %v786_v60, %v1347_v57 }
 0x55a   : > { %1360 = vrsqrt.f32 %v685_v61  ;;  %1197 = vmatpush3.bf16.xpose.msra.mxu0 %v1866_v16  ;;  %1229 = vmatpush3.bf16.xpose.msra.mxu1 %v1866_v16 }
 0x55b   : > { %1362 = vrsqrt.f32 %v684_v62  ;;  %v742_v15 = vpop.xlane.xlu0 %741 }
 0x55c   : > { %v1351_v44 = vpop.eup %1350  ;;  %v748_v24 = vmax.f32 %v742_v15, 1e-24 }
 0x55d   : > { %v1353_v6 = vpop.eup %1352  ;;  %v791_v7 = vsel %vm93_vm1, %v787_v18, %v1351_v44 }
 0x55e   : > { %1364 = vrsqrt.f32 %v748_v24  ;;  %v789_v31 = vsel %vm88_vm0, %v1349_v3, %v1353_v6  ;;  %v926_v3 = vld [vmem:[#allocation4 + $0x18] sm:$0xff]  ;;  %v925_v6 = vld [vmem:[#allocation4 + $0x10] sm:$0xff] }
 0x560   : > { %v1355_v39 = vpop.eup %1354 }
 0x561   : > { %v794_v59 = vsel %vm98_vm2, %v790_v55, %v1355_v39  ;;  %v1357_v10 = vpop.eup %1356 }
 0x562   : > { %v798_v22 = vmul.f32 %v794_v59, %v1725_v8  ;;  %v1359_v26 = vpop.eup %1358 }
 0x563   : > { %v788_v53 = vsel %vm88_vm0, %v1357_v10, %v1359_v26 }
 0x564   : > { %v1361_v36 = vpop.eup %1360  ;;  %1128 = vmatprep.mubr.f32.mxu0 %v798_v22 }
 0x565   : > { %v1363_v38 = vpop.eup %1362  ;;  %v793_v50 = vsel %vm93_vm1, %v789_v31, %v1361_v36 }
 0x566   : > { %v792_v51 = vsel %vm93_vm1, %v788_v53, %v1363_v38 }
 0x568   : > { %v1365_v58 = vpop.eup %1364 }
 0x569   : > { %v796_v14 = vsel %vm98_vm2, %v792_v51, %v1365_v58 }
 0x56a   : > { %v800_v11 = vmul.f32 %v796_v14, %v1728_v13 }
 0x56c   : > { %1131 = vmatprep.mubr.f32.mxu1 %v800_v11 }
 0x597   : > { %v739_v21 = vpop.xlane.xlu1 %738 }
 0x598   : > { %v747_v16 = vmax.f32 %v739_v21, 1e-24 }
 0x59a   : > { %1366 = vrsqrt.f32 %v747_v16 }
 0x59b   : > { %v932_v13 = vpop.permute.xlu1 %931 }
 0x59c   : > { %v745_v8 = vpop.xlane.xlu0 %744 }
 0x59d   : > { %v749_v20 = vmax.f32 %v745_v8, 1e-24 }
 0x59f   : > { %1368 = vrsqrt.f32 %v749_v20  ;;  %v936_v17 = vpop.permute.xlu1 %935 }
 0x5a0   : > { %v934_v54 = vpop.permute.xlu0 %933  ;;  %v969_v52 = vsel %vm88_vm0, %v1547_v25, %v936_v17 }
 0x5a1   : > { %v968_v47 = vsel %vm88_vm0, %v1526_v9, %v934_v54 }
 0x5a3   : > { %v938_v19 = vpop.permute.xlu1 %937 }
 0x5a4   : > { %v1367_v30 = vpop.eup %1366  ;;  %v944_v29 = vpop.permute.xlu0 %943  ;;  %v970_v35 = vsel %vm88_vm0, %v1542_v23, %v938_v19 }
 0x5a5   : > { %v795_v33 = vsel %vm98_vm2, %v791_v7, %v1367_v30 }
 0x5a6   : > { %v799_v46 = vmul.f32 %v795_v33, %v1719_v4  ;;  %v967_v4 = vsel %vm88_vm0, %v1531_v12, %v932_v13 }
 0x5a7   : > { %v946_v28 = vpop.permute.xlu1 %945 }
 0x5a8   : > { %1129 = vmatmul.mubr.f32.vlgmr.msra.gmra.mrb[0].mxu0 %v799_v46  ;;  %v948_v45 = vpop.permute.xlu0 %947  ;;  %v972_v49 = vsel %vm93_vm1, %v968_v47, %v946_v28 }
 0x5a9   : > { %v1369_v48 = vpop.eup %1368  ;;  %v973_v1 = vsel %vm93_vm1, %v969_v52, %v948_v45 }
 0x5aa   : > { %v797_v43 = vsel %vm98_vm2, %v793_v50, %v1369_v48 }
 0x5ab   : > { %v801_v63 = vmul.f32 %v797_v43, %v1722_v5  ;;  %v950_v32 = vpop.permute.xlu1 %949  ;;  %v971_v5 = vsel %vm93_vm1, %v967_v4, %v944_v29 }
 0x5ac   : > { %v956_v27 = vpop.permute.xlu0 %955  ;;  %v974_v18 = vsel %vm93_vm1, %v970_v35, %v950_v32 }
 0x5ad   : > { %1132 = vmatmul.mubr.f32.vlgmr.msra.gmra.mrb[0].mxu1 %v801_v63  ;;  %v975_v9 = vsel %vm98_vm2, %v971_v5, %v956_v27 }
 0x5af   : > { %v958_v41 = vpop.permute.xlu1 %957 }
 0x5b0   : > { %v976_v34 = vsel %vm98_vm2, %v972_v49, %v958_v41  ;;  %v960_v61 = vpop.permute.xlu0 %959 }
 0x5b1   : > { %v977_v15 = vsel %vm98_vm2, %v973_v1, %v960_v61 }
 0x5b3   : > { %v962_v62 = vpop.permute.xlu1 %961 }
 0x5b4   : > { %v978_v25 = vsel %vm98_vm2, %v974_v18, %v962_v62 }
 0x67b   : > { %v1130_v56 = vpop.f32.mrb[0].mxu0 }
 0x67c   : > { %v980_v42 = vmul.f32 %v1130_v56, %v976_v34  ;;  %v904_v12 = vpop.f32.mrb[1].mxu0 }
 0x67d   : > { %v979_v0 = vmul.f32 %v975_v9, %v904_v12 }
 0x67e   : > { %v984_v23 = vadd.f32 %v980_v42, %v924_v40 }
 0x67f   : > { %v983_v2 = vadd.f32 %v979_v0, %v923_v37 }
 0x680   : > { %988 = vst [vmem:[#allocation4 + $0x8] sm:$0xff] %v984_v23  ;;  %v1133_v57 = vpop.f32.mrb[0].mxu1 }
 0x681   : > { %987 = vst [vmem:[#allocation4] sm:$0xff] %v983_v2  ;;  %v982_v44 = vmul.f32 %v1133_v57, %v978_v25  ;;  %v914_v24 = vpop.f32.mrb[1].mxu1 }
 0x682   : > { %v981_v7 = vmul.f32 %v977_v15, %v914_v24 }
 0x683   : > { %v986_v31 = vadd.f32 %v982_v44, %v926_v3 }
 0x684   : > { %v985_v60 = vadd.f32 %v981_v7, %v925_v6 }
 0x685   : > { %990 = vst [vmem:[#allocation4 + $0x18] sm:$0xff] %v986_v31 }
 0x686   : > { %989 = vst [vmem:[#allocation4 + $0x10] sm:$0xff] %v985_v60 }
 0x687 PF: > { %s112_s16 = sadd.s32 1, %s1400_s16  }
 0x688   : > { %p109_p12 = scmp.ge.s32.totalorder %s112_s16, 4  }
 0x689   :  { %v991_v39 = vld [vmem:[#allocation3] sm:$0xff] (%p109_p12)  ;;  %v992_v55 = vld [vmem:[#allocation3 + $0x8] sm:$0xff] (%p109_p12)  ;;  %v993_v59 = vld [vmem:[#allocation3 + $0x10] sm:$0xff] (%p109_p12) }
 0x68a   :  { %111 = sbr.rel (!%p109_p12) target bundleno = 158 (0x9e), region = 51  ;;  %v995_v10 = vmul.f32 (%p109_p12), 0.33333334, %v991_v39  ;;  %v996_v22 = vmul.f32 (%p109_p12), 0.33333334, %v992_v55  ;;  %v994_v36 = vld [vmem:[#allocation3 + $0x18] sm:$0xff] (%p109_p12) }
 0x68b   :  { %v997_v26 = vmul.f32 (%p109_p12), 0.33333334, %v993_v59  ;;  %v998_v38 = vmul.f32 (%p109_p12), 0.33333334, %v994_v36 }
 0x68c   :  { %999 = vst [vmem:[%s1942_s3] sm:$0xff] (%p109_p12), %v995_v10  ;;  %1000 = vst [vmem:[%s1942_s3 + $0x8] sm:$0xff] (%p109_p12), %v996_v22 }
 0x68d   :  { %1001 = vst [vmem:[%s1942_s3 + $0x10] sm:$0xff] (%p109_p12), %v997_v26  ;;  %1002 = vst [vmem:[%s1942_s3 + $0x18] sm:$0xff] (%p109_p12), %v998_v38 }
 0x691   :  { %1007 = vsyncpa [#allocation6], 1 }

</bundles_post_ra>
